<compile_context>
chip_gen: v5e
topology: v5e:2x2
jax: 0.10.0
libtpu: 0.0.40
codegen_flags: <defaults>
</compile_context>

<pallas_src>
import functools

import jax
import jax.numpy as jnp
from jax.experimental import pallas as pl
from jax.experimental.pallas import tpu as pltpu

# Small, module-consistent sizes (QNet defaults: in_dim_max=10, attr_dim=6,
# hidden=512, out_dim=4, ma_num=22 -- scaled down for the demo).
IN_DIM_MAX = 4
ATTR_DIM = 6
FEA_DIM = IN_DIM_MAX * ATTR_DIM      # 24
HIDDEN = 128
OUT_DIM = 4
MA_NUM = 8
BATCH = 2
N_NODES = BATCH * MA_NUM             # 16


def _leaky_relu(x, slope=0.01):
    return jnp.where(x > 0, x, slope * x)


# ------------------------------- fused kernel --------------------------------

def qnet_kernel(adj_ref, x_ref, w1_ref, b1_ref, w2_ref, b2_ref,
                m0h_ref, m0x_ref, mb0_ref, m1_ref, mb1_ref,
                m2_ref, mb2_ref, m3_ref, mb3_ref, o_ref, *, batch, ma_num):
    f32 = jnp.float32
    adj = adj_ref[...]                                  # (N, N) normalized, w/ self loops
    x = x_ref[...]                                      # (N, F) machine-major node order

    # GCNConv1 + leaky_relu:  h = Â (x W1) + b1
    h = jnp.dot(x, w1_ref[...].astype(f32), preferred_element_type=f32)
    h = jnp.dot(adj, h, preferred_element_type=f32) + b1_ref[...]
    h = _leaky_relu(h)
    # GCNConv2 + leaky_relu
    h2 = jnp.dot(h, w2_ref[...].astype(f32), preferred_element_type=f32)
    h2 = jnp.dot(adj, h2, preferred_element_type=f32) + b2_ref[...]
    h2 = _leaky_relu(h2)                                # (N, H)

    # FlattenMlp layer 0 applied to cat([h2, x], 1).reshape(B, ma*(H+F)) WITHOUT the
    # concat/reshape: nodes are machine-major, so machine m of all graphs occupies rows
    # [m*B, (m+1)*B); contract each block against its per-machine fc0 weight slab.
    acc = jnp.zeros((batch, HIDDEN), f32) + mb0_ref[...]
    for m in range(ma_num):                             # static, small loop
        hm = h2[m * batch:(m + 1) * batch, :]           # (B, H)
        xm = x[m * batch:(m + 1) * batch, :]            # (B, F)
        acc = acc + jnp.dot(hm, m0h_ref[m].astype(f32), preferred_element_type=f32)
        acc = acc + jnp.dot(xm, m0x_ref[m].astype(f32), preferred_element_type=f32)
    g = _leaky_relu(acc)
    g = _leaky_relu(jnp.dot(g, m1_ref[...].astype(f32),
                            preferred_element_type=f32) + mb1_ref[...])
    g = _leaky_relu(jnp.dot(g, m2_ref[...].astype(f32),
                            preferred_element_type=f32) + mb2_ref[...])
    logits = jnp.dot(g, m3_ref[...].astype(f32),
                     preferred_element_type=f32) + mb3_ref[...]        # (B, out)

    # log_softmax(dim=1)
    z = logits - jnp.max(logits, axis=1, keepdims=True)
    o_ref[...] = z - jnp.log(jnp.sum(jnp.exp(z), axis=1, keepdims=True))


# ------------------------------- wrapper --------------------------------------

_VMEM_SPEC = pl.BlockSpec(memory_space=pltpu.MemorySpace.VMEM)


def _gcn_dense_adj_and_x(xx, edge_index, edge_weight, batch, ma_num):
    """Symmetric-normalized dense adjacency (with self loops) and node features,
    both permuted to machine-major node order (node b*ma+m -> row m*B+b)."""
    n = xx.shape[0]
    loops = jnp.arange(n, dtype=edge_index.dtype)
    row = jnp.concatenate([edge_index[0], loops])       # source
    col = jnp.concatenate([edge_index[1], loops])       # target
    w = jnp.concatenate([edge_weight.astype(jnp.float32), jnp.ones((n,), jnp.float32)])
    deg = jnp.zeros((n,), jnp.float32).at[col].add(w)
    dinv = jnp.where(deg > 0, jax.lax.rsqrt(deg), 0.0)
    norm = dinv[row] * w * dinv[col]
    node = jnp.arange(n)
    perm = (node % ma_num) * batch + node // ma_num     # machine-major position
    adj = jnp.zeros((n, n), jnp.float32).at[perm[col], perm[row]].add(norm)
    x_p = jnp.zeros((n, xx.shape[1]), jnp.float32).at[perm].set(xx.astype(jnp.float32))
    return adj, x_p


@jax.jit
def qnet_forward(params, xx, edge_index, edge_weight):
    n = xx.shape[0]
    batch = n // MA_NUM
    # TODO(synk): the edge-list scatter below is data-dependent; it stays in plain JAX
    # (dense Â construction). All dense math runs in the single fused Pallas kernel.
    adj, x_p = _gcn_dense_adj_and_x(xx, edge_index, edge_weight, batch, MA_NUM)

    args = (adj, x_p,
            params['w1'], params['b1'], params['w2'], params['b2'],
            params['m0h'], params['m0x'], params['mb0'],
            params['m1'], params['mb1'], params['m2'], params['mb2'],
            params['m3'], params['mb3'])
    kern = functools.partial(qnet_kernel, batch=batch, ma_num=MA_NUM)
    # TODO(synk): when batch grows, grid over graphs with dimension_semantics=("parallel",)
    # so the work shards across TensorCores; at B=2 a single gridless program is optimal.
    return pl.pallas_call(
        kern,
        out_shape=jax.ShapeDtypeStruct((batch, OUT_DIM), jnp.float32),
        in_specs=[_VMEM_SPEC] * len(args),
        out_specs=_VMEM_SPEC,
    )(*args)


# ------------------------------- pure-JAX reference ---------------------------

def qnet_forward_ref(params, xx, edge_index, edge_weight):
    hp = jax.lax.Precision.HIGHEST
    f32 = jnp.float32
    n, _ = xx.shape
    batch = n // MA_NUM

    loops = jnp.arange(n, dtype=edge_index.dtype)
    row = jnp.concatenate([edge_index[0], loops])
    col = jnp.concatenate([edge_index[1], loops])
    w = jnp.concatenate([edge_weight.astype(f32), jnp.ones((n,), f32)])
    deg = jnp.zeros((n,), f32).at[col].add(w)
    dinv = jnp.where(deg > 0, deg ** -0.5, 0.0)
    norm = dinv[row] * w * dinv[col]
    adj = jnp.zeros((n, n), f32).at[col, row].add(norm)   # original node order

    w1 = params['w1'].astype(f32)
    w2 = params['w2'].astype(f32)
    h = _leaky_relu(jnp.dot(adj, jnp.dot(xx, w1, precision=hp), precision=hp) + params['b1'])
    h = _leaky_relu(jnp.dot(adj, jnp.dot(h, w2, precision=hp), precision=hp) + params['b2'])

    cat = jnp.concatenate([h, xx.astype(f32)], axis=1)     # (N, H+F)
    flat = cat.reshape(batch, MA_NUM * (HIDDEN + FEA_DIM))
    # Reassemble the un-permuted fc0 weight from the per-machine blocks used by the kernel.
    blocks = [jnp.concatenate([params['m0h'][m].astype(f32),
                               params['m0x'][m].astype(f32)], axis=0)
              for m in range(MA_NUM)]
    m0_full = jnp.concatenate(blocks, axis=0)              # (MA*(H+F), H)

    g = _leaky_relu(jnp.dot(flat, m0_full, precision=hp) + params['mb0'])
    g = _leaky_relu(jnp.dot(g, params['m1'].astype(f32), precision=hp) + params['mb1'])
    g = _leaky_relu(jnp.dot(g, params['m2'].astype(f32), precision=hp) + params['mb2'])
    logits = jnp.dot(g, params['m3'].astype(f32), precision=hp) + params['mb3']
    return jax.nn.log_softmax(logits, axis=1)


# ------------------------------- deterministic params -------------------------

def init_params(key):
    ks = jax.random.split(key, 16)
    bf16 = jnp.bfloat16

    def unif(k, shape, fan_in, dtype=jnp.float32):
        bound = 1.0 / (fan_in ** 0.5)
        return jax.random.uniform(k, shape, jnp.float32, -bound, bound).astype(dtype)

    flat_in = MA_NUM * (HIDDEN + FEA_DIM)
    p = {}
    # GCNConv weights stored (in, out) (PyTorch/PyG lin weight is (out, in)); bf16.
    p['w1'] = unif(ks[0], (FEA_DIM, HIDDEN), FEA_DIM, bf16)
    p['b1'] = unif(ks[1], (1, HIDDEN), FEA_DIM)
    p['w2'] = unif(ks[2], (HIDDEN, HIDDEN), HIDDEN, bf16)
    p['b2'] = unif(ks[3], (1, HIDDEN), HIDDEN)
    # FlattenMlp fc0 weight pre-split into per-machine [h | x] blocks (offline permute).
    p['m0h'] = unif(ks[4], (MA_NUM, HIDDEN, HIDDEN), flat_in, bf16)
    p['m0x'] = unif(ks[5], (MA_NUM, FEA_DIM, HIDDEN), flat_in, bf16)
    p['mb0'] = unif(ks[6], (1, HIDDEN), flat_in)
    p['m1'] = unif(ks[7], (HIDDEN, HIDDEN), HIDDEN, bf16)
    p['mb1'] = unif(ks[8], (1, HIDDEN), HIDDEN)
    p['m2'] = unif(ks[9], (HIDDEN, HIDDEN), HIDDEN, bf16)
    p['mb2'] = unif(ks[10], (1, HIDDEN), HIDDEN)
    p['m3'] = unif(ks[11], (HIDDEN, OUT_DIM), HIDDEN, bf16)
    p['mb3'] = unif(ks[12], (1, OUT_DIM), HIDDEN)
    return p


# ------------------------------- main ------------------------------------------

if __name__ == "__main__":
    key = jax.random.PRNGKey(0)
    kp, kx, ke = jax.random.split(key, 3)
    params = init_params(kp)

    xx = jax.random.normal(kx, (N_NODES, FEA_DIM), jnp.float32)   # state.x
    # state.edge_index / state.edge_weight: weighted bidirectional ring inside each graph.
    src, dst = [], []
    for b in range(BATCH):
        for m in range(MA_NUM):
            a = b * MA_NUM + m
            c = b * MA_NUM + (m + 1) % MA_NUM
            src += [a, c]
            dst += [c, a]
    edge_index = jnp.array([src, dst], jnp.int32)
    edge_weight = jax.random.uniform(ke, (edge_index.shape[1],), jnp.float32, 0.5, 1.5)

    out = jax.block_until_ready(qnet_forward(params, xx, edge_index, edge_weight))
    ref = qnet_forward_ref(params, xx, edge_index, edge_weight)

    assert out.shape == (BATCH, OUT_DIM), out.shape
    assert bool(jnp.all(jnp.isfinite(out)))
    # rows of log_softmax must (log-)normalize to 0
    assert float(jnp.max(jnp.abs(jax.scipy.special.logsumexp(out, axis=1)))) < 1e-3
    max_err = float(jnp.max(jnp.abs(out - ref)))
    assert max_err < 5e-2, f"mismatch vs reference: {max_err}"
    print("KERNEL_OK")
</pallas_src>

<mosaic_0001>
module attributes {stable_mosaic.version = 11 : i64} {
  func.func @qnet_kernel(%arg0: memref<16x16xf32, #tpu.memory_space<vmem>>, %arg1: memref<16x24xf32, #tpu.memory_space<vmem>>, %arg2: memref<24x128xbf16, #tpu.memory_space<vmem>>, %arg3: memref<1x128xf32, #tpu.memory_space<vmem>>, %arg4: memref<128x128xbf16, #tpu.memory_space<vmem>>, %arg5: memref<1x128xf32, #tpu.memory_space<vmem>>, %arg6: memref<8x128x128xbf16, #tpu.memory_space<vmem>>, %arg7: memref<8x24x128xbf16, #tpu.memory_space<vmem>>, %arg8: memref<1x128xf32, #tpu.memory_space<vmem>>, %arg9: memref<128x128xbf16, #tpu.memory_space<vmem>>, %arg10: memref<1x128xf32, #tpu.memory_space<vmem>>, %arg11: memref<128x128xbf16, #tpu.memory_space<vmem>>, %arg12: memref<1x128xf32, #tpu.memory_space<vmem>>, %arg13: memref<128x4xbf16, #tpu.memory_space<vmem>>, %arg14: memref<1x4xf32, #tpu.memory_space<vmem>>, %arg15: memref<2x4xf32, #tpu.memory_space<vmem>>) attributes {dimension_semantics = [], scalar_prefetch = 0 : i64, scratch_operands = 0 : i64, tpu.core_type = #tpu.core_type<tc>} {
    %c0 = arith.constant 0 : index
    %c0_0 = arith.constant 0 : index
    %0 = vector.load %arg0[%c0, %c0_0] : memref<16x16xf32, #tpu.memory_space<vmem>>, vector<16x16xf32>
    %c0_1 = arith.constant 0 : index
    %c0_2 = arith.constant 0 : index
    %1 = vector.load %arg1[%c0_1, %c0_2] : memref<16x24xf32, #tpu.memory_space<vmem>>, vector<16x24xf32>
    %c0_3 = arith.constant 0 : index
    %c0_4 = arith.constant 0 : index
    %2 = vector.load %arg2[%c0_3, %c0_4] : memref<24x128xbf16, #tpu.memory_space<vmem>>, vector<24x128xbf16>
    %3 = arith.extf %2 : vector<24x128xbf16> to vector<24x128xf32>
    %cst = arith.constant dense<0.000000e+00> : vector<16x128xf32>
    %4 = tpu.matmul %1, %3, %cst {dimension_numbers = #tpu.dot_dimension_numbers<[1], [0], [0], [1], [0, 0, 1, 1], [], []>} : vector<16x24xf32>, vector<24x128xf32>, vector<16x128xf32> -> vector<16x128xf32>
    %cst_5 = arith.constant dense<0.000000e+00> : vector<16x128xf32>
    %5 = tpu.matmul %0, %4, %cst_5 {dimension_numbers = #tpu.dot_dimension_numbers<[1], [0], [0], [1], [0, 0, 1, 1], [], []>} : vector<16x16xf32>, vector<16x128xf32>, vector<16x128xf32> -> vector<16x128xf32>
    %c0_6 = arith.constant 0 : index
    %c0_7 = arith.constant 0 : index
    %6 = vector.load %arg3[%c0_6, %c0_7] : memref<1x128xf32, #tpu.memory_space<vmem>>, vector<1x128xf32>
    %7 = vector.broadcast %6 : vector<1x128xf32> to vector<16x128xf32>
    %8 = arith.addf %5, %7 : vector<16x128xf32>
    %cst_8 = arith.constant 0.000000e+00 : f32
    %9 = vector.broadcast %cst_8 : f32 to vector<16x128xf32>
    %10 = arith.cmpf ogt, %8, %9 : vector<16x128xf32>
    %cst_9 = arith.constant 0.00999999977 : f32
    %11 = vector.broadcast %cst_9 : f32 to vector<16x128xf32>
    %12 = arith.mulf %11, %8 : vector<16x128xf32>
    %13 = arith.select %10, %8, %12 : vector<16x128xi1>, vector<16x128xf32>
    %c0_10 = arith.constant 0 : index
    %c0_11 = arith.constant 0 : index
    %14 = vector.load %arg4[%c0_10, %c0_11] : memref<128x128xbf16, #tpu.memory_space<vmem>>, vector<128x128xbf16>
    %15 = arith.extf %14 : vector<128x128xbf16> to vector<128x128xf32>
    %cst_12 = arith.constant dense<0.000000e+00> : vector<16x128xf32>
    %16 = tpu.matmul %13, %15, %cst_12 {dimension_numbers = #tpu.dot_dimension_numbers<[1], [0], [0], [1], [0, 0, 1, 1], [], []>} : vector<16x128xf32>, vector<128x128xf32>, vector<16x128xf32> -> vector<16x128xf32>
    %cst_13 = arith.constant dense<0.000000e+00> : vector<16x128xf32>
    %17 = tpu.matmul %0, %16, %cst_13 {dimension_numbers = #tpu.dot_dimension_numbers<[1], [0], [0], [1], [0, 0, 1, 1], [], []>} : vector<16x16xf32>, vector<16x128xf32>, vector<16x128xf32> -> vector<16x128xf32>
    %c0_14 = arith.constant 0 : index
    %c0_15 = arith.constant 0 : index
    %18 = vector.load %arg5[%c0_14, %c0_15] : memref<1x128xf32, #tpu.memory_space<vmem>>, vector<1x128xf32>
    %19 = vector.broadcast %18 : vector<1x128xf32> to vector<16x128xf32>
    %20 = arith.addf %17, %19 : vector<16x128xf32>
    %cst_16 = arith.constant 0.000000e+00 : f32
    %21 = vector.broadcast %cst_16 : f32 to vector<16x128xf32>
    %22 = arith.cmpf ogt, %20, %21 : vector<16x128xf32>
    %cst_17 = arith.constant 0.00999999977 : f32
    %23 = vector.broadcast %cst_17 : f32 to vector<16x128xf32>
    %24 = arith.mulf %23, %20 : vector<16x128xf32>
    %25 = arith.select %22, %20, %24 : vector<16x128xi1>, vector<16x128xf32>
    %cst_18 = arith.constant 0.000000e+00 : f32
    %26 = vector.broadcast %cst_18 : f32 to vector<2x128xf32>
    %c0_19 = arith.constant 0 : index
    %c0_20 = arith.constant 0 : index
    %27 = vector.load %arg8[%c0_19, %c0_20] : memref<1x128xf32, #tpu.memory_space<vmem>>, vector<1x128xf32>
    %28 = vector.broadcast %27 : vector<1x128xf32> to vector<2x128xf32>
    %29 = arith.addf %26, %28 : vector<2x128xf32>
    %30 = vector.extract_strided_slice %25 {offsets = [0, 0], sizes = [2, 128], strides = [1, 1]} : vector<16x128xf32> to vector<2x128xf32>
    %31 = vector.extract_strided_slice %1 {offsets = [0, 0], sizes = [2, 24], strides = [1, 1]} : vector<16x24xf32> to vector<2x24xf32>
    %c0_21 = arith.constant 0 : index
    %c0_22 = arith.constant 0 : index
    %c0_23 = arith.constant 0 : index
    %32 = vector.load %arg6[%c0_21, %c0_22, %c0_23] : memref<8x128x128xbf16, #tpu.memory_space<vmem>>, vector<1x128x128xbf16>
    %33 = vector.shape_cast %32 : vector<1x128x128xbf16> to vector<128x128xbf16>
    %34 = arith.extf %33 : vector<128x128xbf16> to vector<128x128xf32>
    %cst_24 = arith.constant dense<0.000000e+00> : vector<2x128xf32>
    %35 = tpu.matmul %30, %34, %cst_24 {dimension_numbers = #tpu.dot_dimension_numbers<[1], [0], [0], [1], [0, 0, 1, 1], [], []>} : vector<2x128xf32>, vector<128x128xf32>, vector<2x128xf32> -> vector<2x128xf32>
    %36 = arith.addf %29, %35 : vector<2x128xf32>
    %c0_25 = arith.constant 0 : index
    %c0_26 = arith.constant 0 : index
    %c0_27 = arith.constant 0 : index
    %37 = vector.load %arg7[%c0_25, %c0_26, %c0_27] : memref<8x24x128xbf16, #tpu.memory_space<vmem>>, vector<1x24x128xbf16>
    %38 = vector.shape_cast %37 : vector<1x24x128xbf16> to vector<24x128xbf16>
    %39 = arith.extf %38 : vector<24x128xbf16> to vector<24x128xf32>
    %cst_28 = arith.constant dense<0.000000e+00> : vector<2x128xf32>
    %40 = tpu.matmul %31, %39, %cst_28 {dimension_numbers = #tpu.dot_dimension_numbers<[1], [0], [0], [1], [0, 0, 1, 1], [], []>} : vector<2x24xf32>, vector<24x128xf32>, vector<2x128xf32> -> vector<2x128xf32>
    %41 = arith.addf %36, %40 : vector<2x128xf32>
    %42 = vector.extract_strided_slice %25 {offsets = [2, 0], sizes = [2, 128], strides = [1, 1]} : vector<16x128xf32> to vector<2x128xf32>
    %43 = vector.extract_strided_slice %1 {offsets = [2, 0], sizes = [2, 24], strides = [1, 1]} : vector<16x24xf32> to vector<2x24xf32>
    %c1 = arith.constant 1 : index
    %c0_29 = arith.constant 0 : index
    %c0_30 = arith.constant 0 : index
    %44 = vector.load %arg6[%c1, %c0_29, %c0_30] : memref<8x128x128xbf16, #tpu.memory_space<vmem>>, vector<1x128x128xbf16>
    %45 = vector.shape_cast %44 : vector<1x128x128xbf16> to vector<128x128xbf16>
    %46 = arith.extf %45 : vector<128x128xbf16> to vector<128x128xf32>
    %cst_31 = arith.constant dense<0.000000e+00> : vector<2x128xf32>
    %47 = tpu.matmul %42, %46, %cst_31 {dimension_numbers = #tpu.dot_dimension_numbers<[1], [0], [0], [1], [0, 0, 1, 1], [], []>} : vector<2x128xf32>, vector<128x128xf32>, vector<2x128xf32> -> vector<2x128xf32>
    %48 = arith.addf %41, %47 : vector<2x128xf32>
    %c1_32 = arith.constant 1 : index
    %c0_33 = arith.constant 0 : index
    %c0_34 = arith.constant 0 : index
    %49 = vector.load %arg7[%c1_32, %c0_33, %c0_34] : memref<8x24x128xbf16, #tpu.memory_space<vmem>>, vector<1x24x128xbf16>
    %50 = vector.shape_cast %49 : vector<1x24x128xbf16> to vector<24x128xbf16>
    %51 = arith.extf %50 : vector<24x128xbf16> to vector<24x128xf32>
    %cst_35 = arith.constant dense<0.000000e+00> : vector<2x128xf32>
    %52 = tpu.matmul %43, %51, %cst_35 {dimension_numbers = #tpu.dot_dimension_numbers<[1], [0], [0], [1], [0, 0, 1, 1], [], []>} : vector<2x24xf32>, vector<24x128xf32>, vector<2x128xf32> -> vector<2x128xf32>
    %53 = arith.addf %48, %52 : vector<2x128xf32>
    %54 = vector.extract_strided_slice %25 {offsets = [4, 0], sizes = [2, 128], strides = [1, 1]} : vector<16x128xf32> to vector<2x128xf32>
    %55 = vector.extract_strided_slice %1 {offsets = [4, 0], sizes = [2, 24], strides = [1, 1]} : vector<16x24xf32> to vector<2x24xf32>
    %c2 = arith.constant 2 : index
    %c0_36 = arith.constant 0 : index
    %c0_37 = arith.constant 0 : index
    %56 = vector.load %arg6[%c2, %c0_36, %c0_37] : memref<8x128x128xbf16, #tpu.memory_space<vmem>>, vector<1x128x128xbf16>
    %57 = vector.shape_cast %56 : vector<1x128x128xbf16> to vector<128x128xbf16>
    %58 = arith.extf %57 : vector<128x128xbf16> to vector<128x128xf32>
    %cst_38 = arith.constant dense<0.000000e+00> : vector<2x128xf32>
    %59 = tpu.matmul %54, %58, %cst_38 {dimension_numbers = #tpu.dot_dimension_numbers<[1], [0], [0], [1], [0, 0, 1, 1], [], []>} : vector<2x128xf32>, vector<128x128xf32>, vector<2x128xf32> -> vector<2x128xf32>
    %60 = arith.addf %53, %59 : vector<2x128xf32>
    %c2_39 = arith.constant 2 : index
    %c0_40 = arith.constant 0 : index
    %c0_41 = arith.constant 0 : index
    %61 = vector.load %arg7[%c2_39, %c0_40, %c0_41] : memref<8x24x128xbf16, #tpu.memory_space<vmem>>, vector<1x24x128xbf16>
    %62 = vector.shape_cast %61 : vector<1x24x128xbf16> to vector<24x128xbf16>
    %63 = arith.extf %62 : vector<24x128xbf16> to vector<24x128xf32>
    %cst_42 = arith.constant dense<0.000000e+00> : vector<2x128xf32>
    %64 = tpu.matmul %55, %63, %cst_42 {dimension_numbers = #tpu.dot_dimension_numbers<[1], [0], [0], [1], [0, 0, 1, 1], [], []>} : vector<2x24xf32>, vector<24x128xf32>, vector<2x128xf32> -> vector<2x128xf32>
    %65 = arith.addf %60, %64 : vector<2x128xf32>
    %66 = vector.extract_strided_slice %25 {offsets = [6, 0], sizes = [2, 128], strides = [1, 1]} : vector<16x128xf32> to vector<2x128xf32>
    %67 = vector.extract_strided_slice %1 {offsets = [6, 0], sizes = [2, 24], strides = [1, 1]} : vector<16x24xf32> to vector<2x24xf32>
    %c3 = arith.constant 3 : index
    %c0_43 = arith.constant 0 : index
    %c0_44 = arith.constant 0 : index
    %68 = vector.load %arg6[%c3, %c0_43, %c0_44] : memref<8x128x128xbf16, #tpu.memory_space<vmem>>, vector<1x128x128xbf16>
    %69 = vector.shape_cast %68 : vector<1x128x128xbf16> to vector<128x128xbf16>
    %70 = arith.extf %69 : vector<128x128xbf16> to vector<128x128xf32>
    %cst_45 = arith.constant dense<0.000000e+00> : vector<2x128xf32>
    %71 = tpu.matmul %66, %70, %cst_45 {dimension_numbers = #tpu.dot_dimension_numbers<[1], [0], [0], [1], [0, 0, 1, 1], [], []>} : vector<2x128xf32>, vector<128x128xf32>, vector<2x128xf32> -> vector<2x128xf32>
    %72 = arith.addf %65, %71 : vector<2x128xf32>
    %c3_46 = arith.constant 3 : index
    %c0_47 = arith.constant 0 : index
    %c0_48 = arith.constant 0 : index
    %73 = vector.load %arg7[%c3_46, %c0_47, %c0_48] : memref<8x24x128xbf16, #tpu.memory_space<vmem>>, vector<1x24x128xbf16>
    %74 = vector.shape_cast %73 : vector<1x24x128xbf16> to vector<24x128xbf16>
    %75 = arith.extf %74 : vector<24x128xbf16> to vector<24x128xf32>
    %cst_49 = arith.constant dense<0.000000e+00> : vector<2x128xf32>
    %76 = tpu.matmul %67, %75, %cst_49 {dimension_numbers = #tpu.dot_dimension_numbers<[1], [0], [0], [1], [0, 0, 1, 1], [], []>} : vector<2x24xf32>, vector<24x128xf32>, vector<2x128xf32> -> vector<2x128xf32>
    %77 = arith.addf %72, %76 : vector<2x128xf32>
    %78 = vector.extract_strided_slice %25 {offsets = [8, 0], sizes = [2, 128], strides = [1, 1]} : vector<16x128xf32> to vector<2x128xf32>
    %79 = vector.extract_strided_slice %1 {offsets = [8, 0], sizes = [2, 24], strides = [1, 1]} : vector<16x24xf32> to vector<2x24xf32>
    %c4 = arith.constant 4 : index
    %c0_50 = arith.constant 0 : index
    %c0_51 = arith.constant 0 : index
    %80 = vector.load %arg6[%c4, %c0_50, %c0_51] : memref<8x128x128xbf16, #tpu.memory_space<vmem>>, vector<1x128x128xbf16>
    %81 = vector.shape_cast %80 : vector<1x128x128xbf16> to vector<128x128xbf16>
    %82 = arith.extf %81 : vector<128x128xbf16> to vector<128x128xf32>
    %cst_52 = arith.constant dense<0.000000e+00> : vector<2x128xf32>
    %83 = tpu.matmul %78, %82, %cst_52 {dimension_numbers = #tpu.dot_dimension_numbers<[1], [0], [0], [1], [0, 0, 1, 1], [], []>} : vector<2x128xf32>, vector<128x128xf32>, vector<2x128xf32> -> vector<2x128xf32>
    %84 = arith.addf %77, %83 : vector<2x128xf32>
    %c4_53 = arith.constant 4 : index
    %c0_54 = arith.constant 0 : index
    %c0_55 = arith.constant 0 : index
    %85 = vector.load %arg7[%c4_53, %c0_54, %c0_55] : memref<8x24x128xbf16, #tpu.memory_space<vmem>>, vector<1x24x128xbf16>
    %86 = vector.shape_cast %85 : vector<1x24x128xbf16> to vector<24x128xbf16>
    %87 = arith.extf %86 : vector<24x128xbf16> to vector<24x128xf32>
    %cst_56 = arith.constant dense<0.000000e+00> : vector<2x128xf32>
    %88 = tpu.matmul %79, %87, %cst_56 {dimension_numbers = #tpu.dot_dimension_numbers<[1], [0], [0], [1], [0, 0, 1, 1], [], []>} : vector<2x24xf32>, vector<24x128xf32>, vector<2x128xf32> -> vector<2x128xf32>
    %89 = arith.addf %84, %88 : vector<2x128xf32>
    %90 = vector.extract_strided_slice %25 {offsets = [10, 0], sizes = [2, 128], strides = [1, 1]} : vector<16x128xf32> to vector<2x128xf32>
    %91 = vector.extract_strided_slice %1 {offsets = [10, 0], sizes = [2, 24], strides = [1, 1]} : vector<16x24xf32> to vector<2x24xf32>
    %c5 = arith.constant 5 : index
    %c0_57 = arith.constant 0 : index
    %c0_58 = arith.constant 0 : index
    %92 = vector.load %arg6[%c5, %c0_57, %c0_58] : memref<8x128x128xbf16, #tpu.memory_space<vmem>>, vector<1x128x128xbf16>
    %93 = vector.shape_cast %92 : vector<1x128x128xbf16> to vector<128x128xbf16>
    %94 = arith.extf %93 : vector<128x128xbf16> to vector<128x128xf32>
    %cst_59 = arith.constant dense<0.000000e+00> : vector<2x128xf32>
    %95 = tpu.matmul %90, %94, %cst_59 {dimension_numbers = #tpu.dot_dimension_numbers<[1], [0], [0], [1], [0, 0, 1, 1], [], []>} : vector<2x128xf32>, vector<128x128xf32>, vector<2x128xf32> -> vector<2x128xf32>
    %96 = arith.addf %89, %95 : vector<2x128xf32>
    %c5_60 = arith.constant 5 : index
    %c0_61 = arith.constant 0 : index
    %c0_62 = arith.constant 0 : index
    %97 = vector.load %arg7[%c5_60, %c0_61, %c0_62] : memref<8x24x128xbf16, #tpu.memory_space<vmem>>, vector<1x24x128xbf16>
    %98 = vector.shape_cast %97 : vector<1x24x128xbf16> to vector<24x128xbf16>
    %99 = arith.extf %98 : vector<24x128xbf16> to vector<24x128xf32>
    %cst_63 = arith.constant dense<0.000000e+00> : vector<2x128xf32>
    %100 = tpu.matmul %91, %99, %cst_63 {dimension_numbers = #tpu.dot_dimension_numbers<[1], [0], [0], [1], [0, 0, 1, 1], [], []>} : vector<2x24xf32>, vector<24x128xf32>, vector<2x128xf32> -> vector<2x128xf32>
    %101 = arith.addf %96, %100 : vector<2x128xf32>
    %102 = vector.extract_strided_slice %25 {offsets = [12, 0], sizes = [2, 128], strides = [1, 1]} : vector<16x128xf32> to vector<2x128xf32>
    %103 = vector.extract_strided_slice %1 {offsets = [12, 0], sizes = [2, 24], strides = [1, 1]} : vector<16x24xf32> to vector<2x24xf32>
    %c6 = arith.constant 6 : index
    %c0_64 = arith.constant 0 : index
    %c0_65 = arith.constant 0 : index
    %104 = vector.load %arg6[%c6, %c0_64, %c0_65] : memref<8x128x128xbf16, #tpu.memory_space<vmem>>, vector<1x128x128xbf16>
    %105 = vector.shape_cast %104 : vector<1x128x128xbf16> to vector<128x128xbf16>
    %106 = arith.extf %105 : vector<128x128xbf16> to vector<128x128xf32>
    %cst_66 = arith.constant dense<0.000000e+00> : vector<2x128xf32>
    %107 = tpu.matmul %102, %106, %cst_66 {dimension_numbers = #tpu.dot_dimension_numbers<[1], [0], [0], [1], [0, 0, 1, 1], [], []>} : vector<2x128xf32>, vector<128x128xf32>, vector<2x128xf32> -> vector<2x128xf32>
    %108 = arith.addf %101, %107 : vector<2x128xf32>
    %c6_67 = arith.constant 6 : index
    %c0_68 = arith.constant 0 : index
    %c0_69 = arith.constant 0 : index
    %109 = vector.load %arg7[%c6_67, %c0_68, %c0_69] : memref<8x24x128xbf16, #tpu.memory_space<vmem>>, vector<1x24x128xbf16>
    %110 = vector.shape_cast %109 : vector<1x24x128xbf16> to vector<24x128xbf16>
    %111 = arith.extf %110 : vector<24x128xbf16> to vector<24x128xf32>
    %cst_70 = arith.constant dense<0.000000e+00> : vector<2x128xf32>
    %112 = tpu.matmul %103, %111, %cst_70 {dimension_numbers = #tpu.dot_dimension_numbers<[1], [0], [0], [1], [0, 0, 1, 1], [], []>} : vector<2x24xf32>, vector<24x128xf32>, vector<2x128xf32> -> vector<2x128xf32>
    %113 = arith.addf %108, %112 : vector<2x128xf32>
    %114 = vector.extract_strided_slice %25 {offsets = [14, 0], sizes = [2, 128], strides = [1, 1]} : vector<16x128xf32> to vector<2x128xf32>
    %115 = vector.extract_strided_slice %1 {offsets = [14, 0], sizes = [2, 24], strides = [1, 1]} : vector<16x24xf32> to vector<2x24xf32>
    %c7 = arith.constant 7 : index
    %c0_71 = arith.constant 0 : index
    %c0_72 = arith.constant 0 : index
    %116 = vector.load %arg6[%c7, %c0_71, %c0_72] : memref<8x128x128xbf16, #tpu.memory_space<vmem>>, vector<1x128x128xbf16>
    %117 = vector.shape_cast %116 : vector<1x128x128xbf16> to vector<128x128xbf16>
    %118 = arith.extf %117 : vector<128x128xbf16> to vector<128x128xf32>
    %cst_73 = arith.constant dense<0.000000e+00> : vector<2x128xf32>
    %119 = tpu.matmul %114, %118, %cst_73 {dimension_numbers = #tpu.dot_dimension_numbers<[1], [0], [0], [1], [0, 0, 1, 1], [], []>} : vector<2x128xf32>, vector<128x128xf32>, vector<2x128xf32> -> vector<2x128xf32>
    %120 = arith.addf %113, %119 : vector<2x128xf32>
    %c7_74 = arith.constant 7 : index
    %c0_75 = arith.constant 0 : index
    %c0_76 = arith.constant 0 : index
    %121 = vector.load %arg7[%c7_74, %c0_75, %c0_76] : memref<8x24x128xbf16, #tpu.memory_space<vmem>>, vector<1x24x128xbf16>
    %122 = vector.shape_cast %121 : vector<1x24x128xbf16> to vector<24x128xbf16>
    %123 = arith.extf %122 : vector<24x128xbf16> to vector<24x128xf32>
    %cst_77 = arith.constant dense<0.000000e+00> : vector<2x128xf32>
    %124 = tpu.matmul %115, %123, %cst_77 {dimension_numbers = #tpu.dot_dimension_numbers<[1], [0], [0], [1], [0, 0, 1, 1], [], []>} : vector<2x24xf32>, vector<24x128xf32>, vector<2x128xf32> -> vector<2x128xf32>
    %125 = arith.addf %120, %124 : vector<2x128xf32>
    %cst_78 = arith.constant 0.000000e+00 : f32
    %126 = vector.broadcast %cst_78 : f32 to vector<2x128xf32>
    %127 = arith.cmpf ogt, %125, %126 : vector<2x128xf32>
    %cst_79 = arith.constant 0.00999999977 : f32
    %128 = vector.broadcast %cst_79 : f32 to vector<2x128xf32>
    %129 = arith.mulf %128, %125 : vector<2x128xf32>
    %130 = arith.select %127, %125, %129 : vector<2x128xi1>, vector<2x128xf32>
    %c0_80 = arith.constant 0 : index
    %c0_81 = arith.constant 0 : index
    %131 = vector.load %arg9[%c0_80, %c0_81] : memref<128x128xbf16, #tpu.memory_space<vmem>>, vector<128x128xbf16>
    %132 = arith.extf %131 : vector<128x128xbf16> to vector<128x128xf32>
    %cst_82 = arith.constant dense<0.000000e+00> : vector<2x128xf32>
    %133 = tpu.matmul %130, %132, %cst_82 {dimension_numbers = #tpu.dot_dimension_numbers<[1], [0], [0], [1], [0, 0, 1, 1], [], []>} : vector<2x128xf32>, vector<128x128xf32>, vector<2x128xf32> -> vector<2x128xf32>
    %c0_83 = arith.constant 0 : index
    %c0_84 = arith.constant 0 : index
    %134 = vector.load %arg10[%c0_83, %c0_84] : memref<1x128xf32, #tpu.memory_space<vmem>>, vector<1x128xf32>
    %135 = vector.broadcast %134 : vector<1x128xf32> to vector<2x128xf32>
    %136 = arith.addf %133, %135 : vector<2x128xf32>
    %cst_85 = arith.constant 0.000000e+00 : f32
    %137 = vector.broadcast %cst_85 : f32 to vector<2x128xf32>
    %138 = arith.cmpf ogt, %136, %137 : vector<2x128xf32>
    %cst_86 = arith.constant 0.00999999977 : f32
    %139 = vector.broadcast %cst_86 : f32 to vector<2x128xf32>
    %140 = arith.mulf %139, %136 : vector<2x128xf32>
    %141 = arith.select %138, %136, %140 : vector<2x128xi1>, vector<2x128xf32>
    %c0_87 = arith.constant 0 : index
    %c0_88 = arith.constant 0 : index
    %142 = vector.load %arg11[%c0_87, %c0_88] : memref<128x128xbf16, #tpu.memory_space<vmem>>, vector<128x128xbf16>
    %143 = arith.extf %142 : vector<128x128xbf16> to vector<128x128xf32>
    %cst_89 = arith.constant dense<0.000000e+00> : vector<2x128xf32>
    %144 = tpu.matmul %141, %143, %cst_89 {dimension_numbers = #tpu.dot_dimension_numbers<[1], [0], [0], [1], [0, 0, 1, 1], [], []>} : vector<2x128xf32>, vector<128x128xf32>, vector<2x128xf32> -> vector<2x128xf32>
    %c0_90 = arith.constant 0 : index
    %c0_91 = arith.constant 0 : index
    %145 = vector.load %arg12[%c0_90, %c0_91] : memref<1x128xf32, #tpu.memory_space<vmem>>, vector<1x128xf32>
    %146 = vector.broadcast %145 : vector<1x128xf32> to vector<2x128xf32>
    %147 = arith.addf %144, %146 : vector<2x128xf32>
    %cst_92 = arith.constant 0.000000e+00 : f32
    %148 = vector.broadcast %cst_92 : f32 to vector<2x128xf32>
    %149 = arith.cmpf ogt, %147, %148 : vector<2x128xf32>
    %cst_93 = arith.constant 0.00999999977 : f32
    %150 = vector.broadcast %cst_93 : f32 to vector<2x128xf32>
    %151 = arith.mulf %150, %147 : vector<2x128xf32>
    %152 = arith.select %149, %147, %151 : vector<2x128xi1>, vector<2x128xf32>
    %c0_94 = arith.constant 0 : index
    %c0_95 = arith.constant 0 : index
    %153 = vector.load %arg13[%c0_94, %c0_95] : memref<128x4xbf16, #tpu.memory_space<vmem>>, vector<128x4xbf16>
    %154 = arith.extf %153 : vector<128x4xbf16> to vector<128x4xf32>
    %cst_96 = arith.constant dense<0.000000e+00> : vector<2x4xf32>
    %155 = tpu.matmul %152, %154, %cst_96 {dimension_numbers = #tpu.dot_dimension_numbers<[1], [0], [0], [1], [0, 0, 1, 1], [], []>} : vector<2x128xf32>, vector<128x4xf32>, vector<2x4xf32> -> vector<2x4xf32>
    %c0_97 = arith.constant 0 : index
    %c0_98 = arith.constant 0 : index
    %156 = vector.load %arg14[%c0_97, %c0_98] : memref<1x4xf32, #tpu.memory_space<vmem>>, vector<1x4xf32>
    %157 = vector.broadcast %156 : vector<1x4xf32> to vector<2x4xf32>
    %158 = arith.addf %155, %157 : vector<2x4xf32>
    %cst_99 = arith.constant dense<0xFF800000> : vector<2xf32>
    %159 = vector.multi_reduction <maximumf>, %158, %cst_99 [1] : vector<2x4xf32> to vector<2xf32>
    %160 = vector.shape_cast %159 : vector<2xf32> to vector<2x1xf32>
    %161 = vector.broadcast %160 : vector<2x1xf32> to vector<2x4xf32>
    %162 = arith.subf %158, %161 : vector<2x4xf32>
    %163 = math.exp %162 : vector<2x4xf32>
    %cst_100 = arith.constant dense<0.000000e+00> : vector<2xf32>
    %164 = vector.multi_reduction <add>, %163, %cst_100 [1] : vector<2x4xf32> to vector<2xf32>
    %165 = vector.shape_cast %164 : vector<2xf32> to vector<2x1xf32>
    %166 = math.log %165 : vector<2x1xf32>
    %167 = vector.broadcast %166 : vector<2x1xf32> to vector<2x4xf32>
    %168 = arith.subf %162, %167 : vector<2x4xf32>
    %c0_101 = arith.constant 0 : index
    %c0_102 = arith.constant 0 : index
    %169 = vector.load %arg15[%c0_101, %c0_102] : memref<2x4xf32, #tpu.memory_space<vmem>>, vector<2x4xf32>
    tpu.vector_store %arg15[%c0_101, %c0_102], %168 {strides = array<i32>} : memref<2x4xf32, #tpu.memory_space<vmem>>, vector<2x4xf32>,
    return
  }
}

</mosaic_0001>

<bundles_post_ra>
// kernel: qnet_forward.1
= control target key start
LH: loop header
LB: loop body
LE: loop exit
PB: predicated region body
PF: predicated region fallthrough
CT: control target
= control target key end

     0   :  { %s2316_s0 = inlined_call_operand.vmem [shape: f32[16,16], index: 0, kind: input, shape index: {}]   ;;  %s2317_s1 = inlined_call_operand.vmem [shape: f32[16,24], index: 1, kind: input, shape index: {}]   ;;  %s2318_s2 = inlined_call_operand.vmem [shape: bf16[24,128], index: 2, kind: input, shape index: {}]   ;;  %s2319_s3 = inlined_call_operand.vmem [shape: f32[1,128], index: 3, kind: input, shape index: {}]   ;;  %s2320_s4 = inlined_call_operand.vmem [shape: bf16[128,128], index: 4, kind: input, shape index: {}]   ;;  %s2321_s5 = inlined_call_operand.vmem [shape: f32[1,128], index: 5, kind: input, shape index: {}]   ;;  %s2322_s6 = inlined_call_operand.vmem [shape: bf16[8,128,128], index: 6, kind: input, shape index: {}]   ;;  %s2323_s7 = inlined_call_operand.vmem [shape: bf16[8,24,128], index: 7, kind: input, shape index: {}]   ;;  %s2324_s8 = inlined_call_operand.vmem [shape: f32[1,128], index: 8, kind: input, shape index: {}]   ;;  %s2325_s9 = inlined_call_operand.vmem [shape: bf16[128,128], index: 9, kind: input, shape index: {}]   ;;  %s2326_s10 = inlined_call_operand.vmem [shape: f32[1,128], index: 10, kind: input, shape index: {}]   ;;  %s2327_s11 = inlined_call_operand.vmem [shape: bf16[128,128], index: 11, kind: input, shape index: {}]   ;;  %s2328_s12 = inlined_call_operand.vmem [shape: f32[1,128], index: 12, kind: input, shape index: {}]   ;;  %s2329_s13 = inlined_call_operand.vmem [shape: bf16[128,4], index: 13, kind: input, shape index: {}]   ;;  %s2330_s14 = inlined_call_operand.vmem [shape: f32[1,4], index: 14, kind: input, shape index: {}]   ;;  %s2331_s15 = inlined_call_operand.hbm [shape: f32[2,4], index: 15, kind: output, shape index: {}]  }
   0x1   :  { %v57_v0 = vld [vmem:[%s2318_s2 + $0x8] sm:$0xf]  ;;  %v1265_v1 = vld [vmem:[%s2318_s2] sm:$0xff]  }
   0x2   :  { %v60_v2 = vunpack.c.l.bf16 %v57_v0  ;;  %v1267_v3 = vunpack.c.h.bf16 %v1265_v1  ;;  %v1266_v4 = vunpack.c.l.bf16 %v1265_v1 }
   0x4   :  { %81 = vmatpush.msra.mxu0 %v60_v2 }
   0x5   :  { %20 = vsyncpa [#allocation3], 0  ;;  %v1909_v5 = vld [vmem:[%s2317_s1] sm:$0xff]  ;;  %vm61_vm0 = vcmask 195584   ;;  %v1916_v6 = vld [vmem:[%s2317_s1 + $0x8] sm:$0xff]  ;;  %vm95_vm1 = vcmask 130048  }
   0x6   :  { %82 = vmatpush.msra.mxu0 %v1267_v3  ;;  %v1690_v7 = vld [vmem:[%s2320_s4 + $0x38] sm:$0xff]   ;;  %v1689_v8 = vld [vmem:[%s2320_s4 + $0x30] sm:$0xff]   ;;  %v1688_v12 = vld [vmem:[%s2320_s4 + $0x28] sm:$0xff]   ;;  %vm1087_vm9 = vcmask 25600   ;;  %s1108_s24 = sshll.u32 %s2331_s15, 4  ;;  %s1109_s24 = int_to_ptr.hbm [resolvable:$true] %s1108_s24 }
   0x7   :  { %v1299_v9 = vunpack.c.h.bf16 %v1690_v7  ;;  %v1298_v10 = vunpack.c.l.bf16 %v1690_v7  ;;  %v1295_v11 = vunpack.c.h.bf16 %v1689_v8  ;;  %v1294_v13 = vunpack.c.l.bf16 %v1689_v8  ;;  %v1687_v15 = vld [vmem:[%s2320_s4 + $0x20] sm:$0xff]   ;;  %v1686_v19 = vld [vmem:[%s2320_s4 + $0x18] sm:$0xff]   ;;  %v1685_v22 = vld [vmem:[%s2320_s4 + $0x10] sm:$0xff]  }
   0x8   :  { %83 = vmatpush.msra.mxu0 %v1266_v4  ;;  %v1291_v14 = vunpack.c.h.bf16 %v1688_v12  ;;  %v1290_v16 = vunpack.c.l.bf16 %v1688_v12  ;;  %v1287_v17 = vunpack.c.h.bf16 %v1687_v15  ;;  %v1286_v20 = vunpack.c.l.bf16 %v1687_v15  ;;  %v1684_v26 = vld [vmem:[%s2320_s4 + $0x8] sm:$0xff]   ;;  %v1944_v27 = vld [vmem:[%s2316_s0] sm:$0xff]  ;;  %v1697_v44 = vld [vmem:[%s2322_s6 + $0x38] sm:$0xff]  }
   0x9   :  { %1117 = vmatmul.msk.f32.vlgmr.msra.gmra.mxu0 %vm61_vm0, %v1909_v5  ;;  %163 = vmatpush.msra.mxu2 %v1299_v9  ;;  %v1283_v21 = vunpack.c.h.bf16 %v1686_v19  ;;  %v1282_v23 = vunpack.c.l.bf16 %v1686_v19  ;;  %v1279_v24 = vunpack.c.h.bf16 %v1685_v22  ;;  %v1278_v28 = vunpack.c.l.bf16 %v1685_v22  ;;  %v1951_v30 = vld [vmem:[%s2316_s0 + $0x8] sm:$0xff]  ;;  %v1269_v32 = vld [vmem:[%s2320_s4] sm:$0xff]   ;;  %v1696_v46 = vld [vmem:[%s2322_s6 + $0x30] sm:$0xff]  }
   0xa   :  { %v1275_v29 = vunpack.c.h.bf16 %v1684_v26  ;;  %v1274_v31 = vunpack.c.l.bf16 %v1684_v26  ;;  %v1271_v33 = vunpack.c.h.bf16 %v1269_v32  ;;  %v1270_v34 = vunpack.c.l.bf16 %v1269_v32  ;;  %v1783_v35 = vld [vmem:[%s2319_s3] ss:$0 sm:$0xff]  ;;  %v1705_v47 = vld [vmem:[%s2322_s6 + $0x78] sm:$0xff]   ;;  %v1695_v54 = vld [vmem:[%s2322_s6 + $0x28] sm:$0xff]  }
   0xb   :  { %164 = vmatpush.msra.mxu2 %v1298_v10  ;;  %v1331_v45 = vunpack.c.h.bf16 %v1697_v44  ;;  %v1330_v48 = vunpack.c.l.bf16 %v1697_v44  ;;  %v1327_v49 = vunpack.c.h.bf16 %v1696_v46  ;;  %v1367_v50 = vunpack.c.h.bf16 %v1705_v47  ;;  %v1723_v53 = vld [vmem:[%s2322_s6 + $0xf8] sm:$0xff]   ;;  %v1704_v55 = vld [vmem:[%s2322_s6 + $0x70] sm:$0xff]   ;;  %v1694_v0 = vld [vmem:[%s2322_s6 + $0x20] sm:$0xff]  }
   0xc   :  { %v1326_v51 = vunpack.c.l.bf16 %v1696_v46  ;;  %v1366_v52 = vunpack.c.l.bf16 %v1705_v47  ;;  %v1439_v56 = vunpack.c.h.bf16 %v1723_v53  ;;  %v1323_v57 = vunpack.c.h.bf16 %v1695_v54  ;;  %v1722_v63 = vld [vmem:[%s2322_s6 + $0xf0] sm:$0xff]   ;;  %v1703_v1 = vld [vmem:[%s2322_s6 + $0x68] sm:$0xff]   ;;  %v1702_v12 = vld [vmem:[%s2322_s6 + $0x60] sm:$0xff]  }
   0xd   :  { %165 = vmatpush.msra.mxu2 %v1295_v11  ;;  %340 = vmatpush.msrb.mxu0 %v1367_v50  ;;  %v1363_v58 = vunpack.c.h.bf16 %v1704_v55  ;;  %v1438_v59 = vunpack.c.l.bf16 %v1723_v53  ;;  %v1322_v60 = vunpack.c.l.bf16 %v1695_v54  ;;  %v1362_v61 = vunpack.c.l.bf16 %v1704_v55  ;;  %v1721_v10 = vld [vmem:[%s2322_s6 + $0xe8] sm:$0xff]   ;;  %v1693_v11 = vld [vmem:[%s2322_s6 + $0x18] sm:$0xff]   ;;  %v1706_v32 = vld [vmem:[%s2323_s7 + $0x10] sm:$0xff]  }
   0xe   :  { %v1435_v2 = vunpack.c.h.bf16 %v1722_v63  ;;  %v1319_v3 = vunpack.c.h.bf16 %v1694_v0  ;;  %v1359_v4 = vunpack.c.h.bf16 %v1703_v1  ;;  %v1434_v7 = vunpack.c.l.bf16 %v1722_v63  ;;  %v1718_v47 = vld [vmem:[%s2322_s6 + $0xd0] sm:$0xff]   ;;  %v1714_v55 = vld [vmem:[%s2322_s6 + $0xb8] sm:$0xff]  }
   0xf   :  { %166 = vmatpush.msra.mxu2 %v1294_v13  ;;  %341 = vmatpush.msrb.mxu0 %v1366_v52  ;;  %v1318_v8 = vunpack.c.l.bf16 %v1694_v0  ;;  %v1358_v9 = vunpack.c.l.bf16 %v1703_v1  ;;  %v2000_v13 = vld [vmem:[%s2323_s7 + $0x8] sm:$0xff]   ;;  %v1315_v15 = vunpack.c.h.bf16 %v1693_v11  ;;  %v1354_v19 = vunpack.c.l.bf16 %v1702_v12  ;;  %v1710_v1 = vld [vmem:[%s2322_s6 + $0x98] sm:$0xff]  }
  0x10   :  { %v282_v22 = vunpack.c.l.bf16 %v2000_v13  ;;  %v1370_v46 = vunpack.c.l.bf16 %v1706_v32  ;;  %v1419_v50 = vunpack.c.h.bf16 %v1718_v47  ;;  %v365_v53 = vunpack.c.h.bf16 %v2000_v13  ;;  %v1162_v13 = vld [vmem:[%s2323_s7 + $0x20] sm:$0xff]  }
  0x11   :  { %1118 = vmatmul.msk.f32.gmra.mxu0 %vm61_vm0, %v1916_v6  ;;  %167 = vmatpush.msra.mxu2 %v1291_v14  ;;  %v1431_v14 = vunpack.c.h.bf16 %v1721_v10  ;;  %v1418_v54 = vunpack.c.l.bf16 %v1718_v47  ;;  %v1747_v47 = vld [vmem:[%s2322_s6 + $0x1a0] sm:$0xff]  }
  0x12   :  { %342 = vmatpush.msrb.mxu0 %v1363_v58  ;;  %v1402_v58 = vunpack.c.l.bf16 %v1714_v55 }
  0x13   :  { %168 = vmatpush.msra.mxu2 %v1290_v16  ;;  %v1355_v16 = vunpack.c.h.bf16 %v1702_v12  ;;  %v1708_v12 = vld [vmem:[%s2322_s6 + $0x88] sm:$0xff]  }
  0x14   :  { %343 = vmatpush.msrb.mxu0 %v1362_v61 }
  0x15   :  { %169 = vmatpush.msra.mxu2 %v1287_v17  ;;  %v1430_v17 = vunpack.c.l.bf16 %v1721_v10 }
  0x16   :  { %344 = vmatpush.msrb.mxu0 %v1359_v4  ;;  %v1709_v4 = vld [vmem:[%s2322_s6 + $0x90] sm:$0xff]  }
  0x17   :  { %170 = vmatpush.msra.mxu2 %v1286_v20 }
  0x18   :  { %345 = vmatpush.msrb.mxu0 %v1358_v9  ;;  %v1382_v9 = vunpack.c.l.bf16 %v1709_v4 }
  0x19   :  { %171 = vmatpush.msra.mxu2 %v1283_v21  ;;  %v1333_v21 = vld [vmem:[%s2323_s7] sm:$0xff]  }
  0x1a   :  { %346 = vmatpush.msrb.mxu0 %v1355_v16  ;;  %v1379_v16 = vunpack.c.h.bf16 %v1708_v12 }
  0x1b   :  { %172 = vmatpush.msra.mxu2 %v1282_v23  ;;  %v1720_v23 = vld [vmem:[%s2322_s6 + $0xe0] sm:$0xff]  }
  0x1c   :  { %v1427_v26 = vunpack.c.h.bf16 %v1720_v23  ;;  %347 = vmatpush.msrb.mxu0 %v1354_v19  ;;  %v1698_v19 = vld [vmem:[%s2322_s6 + $0x40] sm:$0xff]  }
  0x1d   :  { %173 = vmatpush.msra.mxu2 %v1279_v24  ;;  %v1692_v24 = vld [vmem:[%s2322_s6 + $0x10] sm:$0xff]  }
  0x1f   :  { %174 = vmatpush.msra.mxu2 %v1278_v28  ;;  %v1311_v28 = vunpack.c.h.bf16 %v1692_v24 }
  0x21   :  { %175 = vmatpush.msra.mxu2 %v1275_v29 }
  0x23   :  { %176 = vmatpush.msra.mxu2 %v1274_v31  ;;  %v1335_v31 = vunpack.c.h.bf16 %v1333_v21 }
  0x25   :  { %177 = vmatpush.msra.mxu2 %v1271_v33  ;;  %v1426_v33 = vunpack.c.l.bf16 %v1720_v23 }
  0x27   :  { %178 = vmatpush.msra.mxu2 %v1270_v34  ;;  %v1310_v34 = vunpack.c.l.bf16 %v1692_v24 }
  0x29   :  { %514 = vmatpush.msrb.mxu2 %v1439_v56  ;;  %v1403_v56 = vunpack.c.h.bf16 %v1714_v55  ;;  %v1732_v55 = vld [vmem:[%s2322_s6 + $0x138] sm:$0xff]  }
  0x2b   :  { %515 = vmatpush.msrb.mxu2 %v1438_v59  ;;  %v1712_v59 = vld [vmem:[%s2322_s6 + $0xa8] sm:$0xff]  }
  0x2c   :  { %v1395_v61 = vunpack.c.h.bf16 %v1712_v59  ;;  %v1394_v63 = vunpack.c.l.bf16 %v1712_v59 }
  0x2d   :  { %516 = vmatpush.msrb.mxu2 %v1435_v2 }
  0x2f   :  { %517 = vmatpush.msrb.mxu2 %v1434_v7  ;;  %v1386_v7 = vunpack.c.l.bf16 %v1710_v1 }
  0x31   :  { %518 = vmatpush.msrb.mxu2 %v1431_v14  ;;  %v1717_v14 = vld [vmem:[%s2322_s6 + $0xc8] sm:$0xff]  }
  0x32   :  { %v1414_v24 = vunpack.c.l.bf16 %v1717_v14 }
  0x33   :  { %519 = vmatpush.msrb.mxu2 %v1430_v17  ;;  %v454_v17 = vunpack.c.l.bf16 %v1162_v13 }
  0x35   :  { %520 = vmatpush.msrb.mxu2 %v1427_v26  ;;  %v1716_v26 = vld [vmem:[%s2322_s6 + $0xc0] sm:$0xff]  }
  0x37   :  { %521 = vmatpush.msrb.mxu2 %v1426_v33  ;;  %v1724_v33 = vld [vmem:[%s2323_s7 + $0x28] sm:$0xff]  }
  0x86   :  { %v85_v18 = vpop.f32.mrf.mxu0 }
  0x8e   :  { %v88_v25 = vpop.f32.mrf.mxu0 }
  0x8f   :  { %116 = vmatpush.msra.mxu1 %v88_v25  ;;  %v1701_v25 = vld [vmem:[%s2322_s6 + $0x58] sm:$0xff]  }
  0x90   :  { %v1351_v29 = vunpack.c.h.bf16 %v1701_v25 }
  0x91   :  { %117 = vmatpush.msra.mxu1 %v85_v18  ;;  %v1314_v18 = vunpack.c.l.bf16 %v1693_v11  ;;  %v368_v11 = vrot.slane %v1909_v5, 2 }
  0x92   :  { %1119 = vmatmul.msk.f32.vlgmr.msra.gmra.mxu1 %vm95_vm1, %v1944_v27  ;;  %348 = vmatpush.msrb.mxu0 %v1351_v29 }
  0x93   :  { %256 = vmatpush.msrb.mxu1 %v1331_v45 }
  0x95   :  { %257 = vmatpush.msrb.mxu1 %v1330_v48  ;;  %v1301_v48 = vld [vmem:[%s2322_s6] sm:$0xff]  }
  0x96   :  { %v1302_v10 = vunpack.c.l.bf16 %v1301_v48 }
  0x97   :  { %258 = vmatpush.msrb.mxu1 %v1327_v49  ;;  %v1699_v49 = vld [vmem:[%s2322_s6 + $0x48] sm:$0xff]  }
  0x98   :  { %v1343_v52 = vunpack.c.h.bf16 %v1699_v49 }
  0x99   :  { %259 = vmatpush.msrb.mxu1 %v1326_v51  ;;  %v1303_v51 = vunpack.c.h.bf16 %v1301_v48  ;;  %v1535_v48 = vunpack.c.h.bf16 %v1747_v47 }
  0x9a   :  { %1120 = vmatmul.msk.f32.gmra.mxu1 %vm95_vm1, %v1951_v30 }
  0x9b   :  { %260 = vmatpush.msrb.mxu1 %v1323_v57  ;;  %v1713_v57 = vld [vmem:[%s2322_s6 + $0xb0] sm:$0xff]  }
  0x9d   :  { %261 = vmatpush.msrb.mxu1 %v1322_v60  ;;  %v1398_v60 = vunpack.c.l.bf16 %v1713_v57 }
  0x9f   :  { %262 = vmatpush.msrb.mxu1 %v1319_v3  ;;  %v1387_v3 = vunpack.c.h.bf16 %v1710_v1 }
  0xa1   :  { %263 = vmatpush.msrb.mxu1 %v1318_v8  ;;  %v1383_v8 = vunpack.c.h.bf16 %v1709_v4  ;;  %v1733_v4 = vld [vmem:[%s2323_s7 + $0x30] sm:$0xff]  }
  0xa3   :  { %264 = vmatpush.msrb.mxu1 %v1315_v15  ;;  %v1342_v15 = vunpack.c.l.bf16 %v1699_v49  ;;  %v1534_v49 = vunpack.c.l.bf16 %v1747_v47  ;;  %v1739_v47 = vld [vmem:[%s2322_s6 + $0x168] sm:$0xff]  }
  0xa5   :  { %265 = vmatpush.msrb.mxu1 %v1314_v18  ;;  %v1415_v18 = vunpack.c.h.bf16 %v1717_v14 }
  0xa7   :  { %266 = vmatpush.msrb.mxu1 %v1311_v28  ;;  %v1338_v28 = vunpack.c.l.bf16 %v1698_v19 }
  0xa9   :  { %267 = vmatpush.msrb.mxu1 %v1310_v34  ;;  %v1443_v34 = vunpack.c.h.bf16 %v1724_v33 }
 0x10f   :  { %v119_v36 = vpop.f32.mrf.mxu1 }
 0x110   :  { %v120_v37 = vadd.f32 %v1783_v35, %v119_v36  ;;  %v1334_v36 = vunpack.c.l.bf16 %v1333_v21  ;;  %v1339_v21 = vunpack.c.h.bf16 %v1698_v19 }
 0x112   :  { %vm125_vm2 = vcmp.gt.f32.partialorder %v120_v37, 0.0  ;;  %v127_v38 = vmul.f32 0.01, %v120_v37 }
 0x114   :  { %v129_v39 = vsel %vm125_vm2, %v120_v37, %v127_v38  ;;  %v1719_v37 = vld [vmem:[%s2322_s6 + $0xd8] sm:$0xff]   ;;  %v1691_v38 = vld [vmem:[%s2322_s6 + $0x8] sm:$0xff]  }
 0x115   :  { %179 = vmatmul.f32.vlgmr.msra.gmra.mxu2 %v129_v39  ;;  %v1700_v39 = vld [vmem:[%s2322_s6 + $0x50] sm:$0xff]   ;;  %v1306_v44 = vunpack.c.l.bf16 %v1691_v38 }
 0x116   :  { %v1346_v45 = vunpack.c.l.bf16 %v1700_v39 }
 0x117   :  { %v122_v40 = vpop.f32.mrf.mxu1 }
 0x118   :  { %v123_v41 = vadd.f32 %v1783_v35, %v122_v40  ;;  %v1350_v35 = vunpack.c.l.bf16 %v1701_v25  ;;  %v1371_v40 = vunpack.c.h.bf16 %v1706_v32  ;;  %v1707_v25 = vld [vmem:[%s2322_s6 + $0x80] sm:$0xff]   ;;  %v1411_v32 = vunpack.c.h.bf16 %v1716_v26 }
 0x119   :  { %v1375_v29 = vunpack.c.h.bf16 %v1707_v25 }
 0x11a   :  { %vm126_vm3 = vcmp.gt.f32.partialorder %v123_v41, 0.0  ;;  %v128_v42 = vmul.f32 0.01, %v123_v41  ;;  %349 = vmatpush.msrb.mxu0 %v1350_v35  ;;  %v1374_v35 = vunpack.c.l.bf16 %v1707_v25  ;;  %v1741_v25 = vld [vmem:[%s2322_s6 + $0x178] sm:$0xff]  }
 0x11c   :  { %v130_v43 = vsel %vm126_vm3, %v123_v41, %v128_v42  ;;  %v1307_v41 = vunpack.c.h.bf16 %v1691_v38  ;;  %v1347_v42 = vunpack.c.h.bf16 %v1700_v39  ;;  %v539_v38 = vunpack.c.h.bf16 %v1162_v13  ;;  %v1750_v39 = vld [vmem:[%s2322_s6 + $0x1b8] sm:$0xff]  }
 0x11d   :  { %182 = vmatmul.f32.gmra.mxu2 %v130_v43  ;;  %v1422_v43 = vunpack.c.l.bf16 %v1719_v37 }
 0x11e   :  { %268 = vmatpush.msrb.mxu1 %v1307_v41  ;;  %350 = vmatpush.msrb.mxu0 %v1347_v42  ;;  %v1749_v41 = vld [vmem:[%s2322_s6 + $0x1b0] sm:$0xff]  }
 0x11f   :  { %v1543_v42 = vunpack.c.h.bf16 %v1749_v41 }
 0x120   :  { %269 = vmatpush.msrb.mxu1 %v1306_v44  ;;  %351 = vmatpush.msrb.mxu0 %v1346_v45  ;;  %v1748_v44 = vld [vmem:[%s2322_s6 + $0x1a8] sm:$0xff]  }
 0x121   :  { %v1539_v45 = vunpack.c.h.bf16 %v1748_v44 }
 0x122   :  { %270 = vmatpush.msrb.mxu1 %v1303_v51  ;;  %352 = vmatpush.msrb.mxu0 %v1343_v52  ;;  %v1784_v51 = vld [vmem:[%s2321_s5] ss:$0 sm:$0xff] }
 0x124   :  { %271 = vmatpush.msrb.mxu1 %v1302_v10  ;;  %353 = vmatpush.msrb.mxu0 %v1342_v15  ;;  %v1479_v15 = vunpack.c.h.bf16 %v1733_v4 }
 0x126   :  { %471 = vmatpush.msra.mxu1 %v454_v17  ;;  %354 = vmatpush.msrb.mxu0 %v1339_v21  ;;  %v1743_v21 = vld [vmem:[%s2322_s6 + $0x180] sm:$0xff]  }
 0x128   :  { %355 = vmatpush.msrb.mxu0 %v1338_v28 }
 0x12a   :  { %558 = vmatpush.msra.mxu0 %v1443_v34  ;;  %v1729_v34 = vld [vmem:[%s2322_s6 + $0x120] sm:$0xff]  }
 0x198   :  { %v180_v62 = vpop.f32.mrf.mxu2 }
 0x1a0   :  { %v183_v20 = vpop.f32.mrf.mxu2 }
 0x1a1   :  { %204 = vmatpush.msra.mxu3 %v183_v20  ;;  %v1715_v20 = vld [vmem:[%s2323_s7 + $0x18] sm:$0xff]  }
 0x1a2   :  { %v1407_v23 = vunpack.c.h.bf16 %v1715_v20 }
 0x1a3   :  { %205 = vmatpush.msra.mxu3 %v180_v62  ;;  %v1711_v62 = vld [vmem:[%s2322_s6 + $0xa0] sm:$0xff]  }
 0x1a4   :  { %1121 = vmatmul.msk.f32.vlgmr.msra.gmra.mxu3 %vm95_vm1, %v1944_v27  ;;  %v1423_v27 = vunpack.c.h.bf16 %v1719_v37  ;;  %v1391_v0 = vunpack.c.h.bf16 %v1711_v62  ;;  %v1390_v2 = vunpack.c.l.bf16 %v1711_v62  ;;  %472 = vmatpush.msra.mxu1 %v1407_v23  ;;  %v1442_v37 = vunpack.c.l.bf16 %v1724_v33  ;;  %v1202_v62 = vld [vmem:[%s2323_s7 + $0x38] sm:$0xff]  }
 0x1a5   :  { %296 = vmatpush.msrb.mxu3 %v282_v22  ;;  %v1378_v22 = vunpack.c.l.bf16 %v1708_v12  ;;  %v709_v13 = vunpack.c.h.bf16 %v1202_v62  ;;  %v1478_v23 = vunpack.c.l.bf16 %v1733_v4  ;;  %v542_v33 = vrot.slane %v1909_v5, 6  ;;  %v1736_v4 = vld [vmem:[%s2322_s6 + $0x150] sm:$0xff]  }
 0x1a6   :  { %522 = vmatpush.msrb.mxu2 %v1423_v27  ;;  %559 = vmatpush.msra.mxu0 %v1442_v37  ;;  %v1546_v27 = vunpack.c.l.bf16 %v1750_v39  ;;  %v1511_v37 = vunpack.c.h.bf16 %v1741_v25 }
 0x1a7   :  { %297 = vmatpush.msrb.mxu3 %v1335_v31  ;;  %v1406_v31 = vunpack.c.l.bf16 %v1715_v20 }
 0x1a8   :  { %523 = vmatpush.msrb.mxu2 %v1422_v43  ;;  %560 = vmatpush.msra.mxu0 %v539_v38  ;;  %v1542_v43 = vunpack.c.l.bf16 %v1749_v41  ;;  %v1740_v38 = vld [vmem:[%s2322_s6 + $0x170] sm:$0xff]  }
 0x1a9   :  { %298 = vmatpush.msrb.mxu3 %v1334_v36  ;;  %473 = vmatpush.msra.mxu1 %v1406_v31  ;;  %v1410_v36 = vunpack.c.l.bf16 %v1716_v26  ;;  %v1519_v31 = vunpack.c.h.bf16 %v1743_v21 }
 0x1aa   :  { %524 = vmatpush.msrb.mxu2 %v1419_v50  ;;  %v1746_v50 = vld [vmem:[%s2322_s6 + $0x198] sm:$0xff]  }
 0x1ab   :  { %384 = vmatpush.msra.mxu3 %v1371_v40  ;;  %v1547_v40 = vunpack.c.h.bf16 %v1750_v39  ;;  %v1531_v52 = vunpack.c.h.bf16 %v1746_v50 }
 0x1ac   :  { %1122 = vmatmul.msk.f32.gmra.mxu3 %vm95_vm1, %v1951_v30  ;;  %525 = vmatpush.msrb.mxu2 %v1418_v54  ;;  %v1399_v30 = vunpack.c.h.bf16 %v1713_v57  ;;  %v1745_v57 = vld [vmem:[%s2322_s6 + $0x190] sm:$0xff]  }
 0x1ad   :  { %385 = vmatpush.msra.mxu3 %v1370_v46  ;;  %v1538_v46 = vunpack.c.l.bf16 %v1748_v44  ;;  %v1527_v59 = vunpack.c.h.bf16 %v1745_v57  ;;  %v1526_v1 = vunpack.c.l.bf16 %v1745_v57  ;;  %v1726_v57 = vld [vmem:[%s2322_s6 + $0x108] sm:$0xff]  }
 0x1ae   :  { %526 = vmatpush.msrb.mxu2 %v1415_v18 }
 0x1af   :  { %386 = vmatpush.msra.mxu3 %v365_v53  ;;  %v1530_v53 = vunpack.c.l.bf16 %v1746_v50  ;;  %v1727_v50 = vld [vmem:[%s2322_s6 + $0x110] sm:$0xff]  }
 0x1b0   :  { %527 = vmatpush.msrb.mxu2 %v1414_v24  ;;  %v455_v24 = vrot.slane %v1909_v5, 4 }
 0x1b2   :  { %528 = vmatpush.msrb.mxu2 %v1411_v32  ;;  %v1751_v32 = vld [vmem:[%s2323_s7 + $0x48] sm:$0xff]  }
 0x1b3   :  { %v1551_v39 = vunpack.c.h.bf16 %v1751_v32  ;;  %v1550_v44 = vunpack.c.l.bf16 %v1751_v32 }
 0x1b4   :  { %1123 = vmatmul.msk.f32.vlgmr.msrb.gmra.mxu3 %vm61_vm0, %v1909_v5  ;;  %529 = vmatpush.msrb.mxu2 %v1410_v36  ;;  %v1518_v5 = vunpack.c.l.bf16 %v1743_v21 }
 0x1b5   :  { %427 = vmatpush.msrb.mxu3 %v1403_v56  ;;  %v1742_v56 = vld [vmem:[%s2323_s7 + $0x40] sm:$0xff]  }
 0x1b6   :  { %771 = vmatpush.msra.mxu2 %v1547_v40  ;;  %v1463_v40 = vunpack.c.h.bf16 %v1729_v34 }
 0x1b7   :  { %428 = vmatpush.msrb.mxu3 %v1402_v58 }
 0x1b8   :  { %772 = vmatpush.msra.mxu2 %v1546_v27  ;;  %v1510_v27 = vunpack.c.l.bf16 %v1741_v25 }
 0x1b9   :  { %429 = vmatpush.msrb.mxu3 %v1399_v30  ;;  %v1515_v30 = vunpack.c.h.bf16 %v1742_v56 }
 0x1ba   :  { %773 = vmatpush.msra.mxu2 %v1543_v42  ;;  %v1728_v42 = vld [vmem:[%s2322_s6 + $0x118] sm:$0xff]  }
 0x1bb   :  { %430 = vmatpush.msrb.mxu3 %v1398_v60 }
 0x1bc   :  { %1143 = vmatmul.msk.f32.vlgmr.msra.gmra.mxu3 %vm61_vm0, %v368_v11  ;;  %774 = vmatpush.msra.mxu2 %v1542_v43  ;;  %v626_v11 = vunpack.c.l.bf16 %v1202_v62  ;;  %v1451_v62 = vunpack.c.h.bf16 %v1726_v57 }
 0x1bd   :  { %431 = vmatpush.msrb.mxu3 %v1395_v61  ;;  %v1475_v61 = vunpack.c.h.bf16 %v1732_v55 }
 0x1be   :  { %775 = vmatpush.msra.mxu2 %v1539_v45  ;;  %v1462_v45 = vunpack.c.l.bf16 %v1729_v34 }
 0x1bf   :  { %432 = vmatpush.msrb.mxu3 %v1394_v63  ;;  %v1731_v63 = vld [vmem:[%s2322_s6 + $0x130] sm:$0xff]  }
 0x1c0   :  { %776 = vmatpush.msra.mxu2 %v1538_v46  ;;  %v1471_v12 = vunpack.c.h.bf16 %v1731_v63  ;;  %v1470_v18 = vunpack.c.l.bf16 %v1731_v63  ;;  %v1507_v46 = vunpack.c.h.bf16 %v1740_v38 }
 0x1c1   :  { %433 = vmatpush.msrb.mxu3 %v1391_v0  ;;  %v1514_v0 = vunpack.c.l.bf16 %v1742_v56  ;;  %v1502_v56 = vunpack.c.l.bf16 %v1739_v47 }
 0x1c2   :  { %777 = vmatpush.msra.mxu2 %v1535_v48  ;;  %v1459_v48 = vunpack.c.h.bf16 %v1728_v42 }
 0x1c3   :  { %434 = vmatpush.msrb.mxu3 %v1390_v2 }
 0x1c4   :  { %778 = vmatpush.msra.mxu2 %v1534_v49  ;;  %v1506_v49 = vunpack.c.l.bf16 %v1740_v38 }
 0x1c5   :  { %435 = vmatpush.msrb.mxu3 %v1387_v3  ;;  %v1474_v3 = vunpack.c.l.bf16 %v1732_v55  ;;  %v1455_v55 = vunpack.c.h.bf16 %v1727_v50 }
 0x1c6   :  { %779 = vmatpush.msra.mxu2 %v1531_v52  ;;  %v1458_v52 = vunpack.c.l.bf16 %v1728_v42 }
 0x1c7   :  { %436 = vmatpush.msrb.mxu3 %v1386_v7  ;;  %v1744_v7 = vld [vmem:[%s2322_s6 + $0x188] sm:$0xff]  }
 0x1c8   :  { %780 = vmatpush.msra.mxu2 %v1530_v53  ;;  %v1523_v14 = vunpack.c.h.bf16 %v1744_v7  ;;  %v1522_v20 = vunpack.c.l.bf16 %v1744_v7  ;;  %v1503_v53 = vunpack.c.h.bf16 %v1739_v47 }
 0x1c9   :  { %437 = vmatpush.msrb.mxu3 %v1383_v8 }
 0x1ca   :  { %781 = vmatpush.msra.mxu2 %v1527_v59  ;;  %v1760_v59 = vld [vmem:[%s2323_s7 + $0x58] sm:$0xff]  }
 0x1cb   :  { %438 = vmatpush.msrb.mxu3 %v1382_v9 }
 0x1cc   :  { %782 = vmatpush.msra.mxu2 %v1526_v1  ;;  %v1450_v1 = vunpack.c.l.bf16 %v1726_v57 }
 0x1cd   :  { %439 = vmatpush.msrb.mxu3 %v1379_v16  ;;  %v1730_v16 = vld [vmem:[%s2322_s6 + $0x128] sm:$0xff]  }
 0x1ce   :  { %v1467_v28 = vunpack.c.h.bf16 %v1730_v16  ;;  %783 = vmatpush.msra.mxu2 %v1523_v14  ;;  %v1466_v36 = vunpack.c.l.bf16 %v1730_v16  ;;  %v1735_v14 = vld [vmem:[%s2322_s6 + $0x148] sm:$0xff]   ;;  %v1490_v16 = vunpack.c.l.bf16 %v1736_v4 }
 0x1cf   :  { %440 = vmatpush.msrb.mxu3 %v1378_v22  ;;  %v2135_v22 = vld [vmem:[%s2323_s7 + $0x50] sm:$0xff]   ;;  %v1486_v21 = vunpack.c.l.bf16 %v1735_v14 }
 0x1d0   :  { %v798_v26 = vunpack.c.l.bf16 %v2135_v22  ;;  %784 = vmatpush.msra.mxu2 %v1522_v20 }
 0x1d1   :  { %441 = vmatpush.msrb.mxu3 %v1375_v29 }
 0x1d2   :  { %785 = vmatpush.msra.mxu2 %v1519_v31 }
 0x1d3   :  { %442 = vmatpush.msrb.mxu3 %v1374_v35  ;;  %v712_v35 = vrot.slane %v1916_v6, 2 }
 0x1d4   :  { %786 = vmatpush.msra.mxu2 %v1518_v5  ;;  %v1753_v5 = vld [vmem:[%s2322_s6 + $0x1c8] sm:$0xff]  }
 0x1d5   :  { %728 = vmatpush.msra.mxu3 %v1515_v30  ;;  %v1558_v42 = vunpack.c.l.bf16 %v1753_v5 }
 0x1d7   :  { %729 = vmatpush.msra.mxu3 %v1514_v0  ;;  %v1725_v0 = vld [vmem:[%s2322_s6 + $0x100] sm:$0xff]  }
 0x1d8   :  { %v1447_v7 = vunpack.c.h.bf16 %v1725_v0 }
 0x1d9   :  { %730 = vmatpush.msra.mxu3 %v709_v13  ;;  %v1491_v13 = vunpack.c.h.bf16 %v1736_v4 }
 0x227   :  { %v207_v54 = vpop.f32.mrf.mxu3 }
 0x228   :  { %v208_v58 = vadd.f32 %v1784_v51, %v207_v54  ;;  %v1738_v54 = vld [vmem:[%s2322_s6 + $0x160] sm:$0xff]  }
 0x229   :  { %v1499_v30 = vunpack.c.h.bf16 %v1738_v54  ;;  %v1498_v63 = vunpack.c.l.bf16 %v1738_v54  ;;  %v1765_v54 = vld [vmem:[%s2325_s9 + $0x28] sm:$0xff]  }
 0x22a   :  { %vm213_vm4 = vcmp.gt.f32.partialorder %v208_v58, 0.0  ;;  %v215_v60 = vmul.f32 0.01, %v208_v58  ;;  %v1610_v57 = vunpack.c.l.bf16 %v1765_v54 }
 0x22c   :  { %v217_v2 = vsel %vm213_vm4, %v208_v58, %v215_v60  ;;  %v1454_v58 = vunpack.c.l.bf16 %v1727_v50  ;;  %v1737_v60 = vld [vmem:[%s2322_s6 + $0x158] sm:$0xff]   ;;  %v1766_v50 = vld [vmem:[%s2325_s9 + $0x30] sm:$0xff]  }
 0x22d   :  { %272 = vmatmul.f32.vlgmr.msrb.gmra.mxu1 %v217_v2  ;;  %v338_v8 = vrot.slane %v217_v2, 2  ;;  %v425_v9 = vrot.slane %v217_v2, 4  ;;  %v512_v10 = vrot.slane %v217_v2, 6  ;;  %v1495_v2 = vunpack.c.h.bf16 %v1737_v60 }
 0x22e   :  { %599 = vmatpush.msrb.mxu1 %v1475_v61  ;;  %v1587_v61 = vunpack.c.h.bf16 %v1760_v59 }
 0x22f   :  { %356 = vmatmul.f32.vlgmr.msrb.gmra.mxu0 %v338_v8  ;;  %443 = vmatmul.f32.vlgmr.msrb.gmra.mxu3 %v425_v9  ;;  %v210_v17 = vpop.f32.mrf.mxu3  ;;  %v1494_v8 = vunpack.c.l.bf16 %v1737_v60  ;;  %v883_v9 = vunpack.c.h.bf16 %v2135_v22  ;;  %v1757_v22 = vld [vmem:[%s2322_s6 + $0x1e8] sm:$0xff]   ;;  %v1763_v60 = vld [vmem:[%s2325_s9 + $0x18] sm:$0xff]  }
 0x230   :  { %530 = vmatmul.f32.vlgmr.msrb.gmra.mxu2 %v512_v10  ;;  %600 = vmatpush.msrb.mxu1 %v1474_v3  ;;  %v211_v19 = vadd.f32 %v1784_v51, %v210_v17  ;;  %v799_v51 = vrot.slane %v1916_v6, 4  ;;  %v1586_v3 = vunpack.c.l.bf16 %v1760_v59  ;;  %v1759_v10 = vld [vmem:[%s2322_s6 + $0x1f8] sm:$0xff]   ;;  %v1758_v17 = vld [vmem:[%s2322_s6 + $0x1f0] sm:$0xff]   ;;  %v1575_v25 = vunpack.c.h.bf16 %v1757_v22 }
 0x231   :  { %640 = vmatpush.msrb.mxu0 %v626_v11  ;;  %815 = vmatpush.msrb.mxu3 %v798_v26  ;;  %v886_v11 = vrot.slane %v1916_v6, 6  ;;  %v1579_v20 = vunpack.c.h.bf16 %v1758_v17  ;;  %v1574_v31 = vunpack.c.l.bf16 %v1757_v22  ;;  %v1774_v22 = vld [vmem:[%s2327_s11 + $0x38] sm:$0xff]  }
 0x232   :  { %601 = vmatpush.msrb.mxu1 %v1471_v12  ;;  %v216_v29 = vmul.f32 0.01, %v211_v19  ;;  %vm214_vm5 = vcmp.gt.f32.partialorder %v211_v19, 0.0  ;;  %v1446_v12 = vunpack.c.l.bf16 %v1725_v0 }
 0x233   :  { %641 = vmatpush.msrb.mxu0 %v1479_v15  ;;  %816 = vmatpush.msrb.mxu3 %v1551_v39  ;;  %v1583_v15 = vunpack.c.h.bf16 %v1759_v10 }
 0x234   :  { %602 = vmatpush.msrb.mxu1 %v1470_v18  ;;  %v2154_v41 = vsel %vm214_vm5, %v211_v19, %v216_v29  ;;  %v1487_v18 = vunpack.c.h.bf16 %v1735_v14  ;;  %v1734_v19 = vld [vmem:[%s2322_s6 + $0x140] sm:$0xff]  }
 0x235   :  { %642 = vmatpush.msrb.mxu0 %v1478_v23  ;;  %1163 = vmatmul.msk.f32.vlgmr.msra.gmra.mxu1 %vm61_vm0, %v455_v24  ;;  %v769_v43 = vrot.slane %v2154_v41, 4  ;;  %v1578_v23 = vunpack.c.l.bf16 %v1758_v17  ;;  %v1483_v24 = vunpack.c.h.bf16 %v1734_v19  ;;  %v1482_v26 = vunpack.c.l.bf16 %v1734_v19  ;;  %v1756_v29 = vld [vmem:[%s2322_s6 + $0x1e0] sm:$0xff]  }
 0x236   :  { %603 = vmatpush.msrb.mxu1 %v1467_v28  ;;  %817 = vmatpush.msrb.mxu3 %v1550_v44  ;;  %v682_v28 = vrot.slane %v2154_v41, 2  ;;  %v1571_v32 = vunpack.c.h.bf16 %v1756_v29  ;;  %v1570_v34 = vunpack.c.l.bf16 %v1756_v29 }
 0x237   :  { %1183 = vmatmul.msk.f32.vlgmr.msra.gmra.mxu0 %vm61_vm0, %v542_v33  ;;  %1223 = vmatmul.msk.f32.vlgmr.msra.gmra.mxu3 %vm61_vm0, %v712_v35  ;;  %v1755_v33 = vld [vmem:[%s2322_s6 + $0x1d8] sm:$0xff]  }
 0x238   :  { %604 = vmatpush.msrb.mxu1 %v1466_v36  ;;  %684 = vmatpush.msra.mxu0 %v1511_v37  ;;  %v1567_v35 = vunpack.c.h.bf16 %v1755_v33  ;;  %v1754_v36 = vld [vmem:[%s2322_s6 + $0x1d0] sm:$0xff]   ;;  %v1566_v37 = vunpack.c.l.bf16 %v1755_v33 }
 0x239   :  { %787 = vmatmul.f32.vlgmr.msra.gmra.mxu2 %v769_v43  ;;  %902 = vmatpush.msra.mxu3 %v1587_v61  ;;  %v1563_v38 = vunpack.c.h.bf16 %v1754_v36  ;;  %v1562_v39 = vunpack.c.l.bf16 %v1754_v36 }
 0x23a   :  { %605 = vmatpush.msrb.mxu1 %v1463_v40  ;;  %685 = vmatpush.msra.mxu0 %v1510_v27  ;;  %v1559_v40 = vunpack.c.h.bf16 %v1753_v5  ;;  %v1752_v27 = vld [vmem:[%s2322_s6 + $0x1c0] sm:$0xff]  }
 0x23b   :  { %903 = vmatpush.msra.mxu3 %v1586_v3  ;;  %v1555_v43 = vunpack.c.h.bf16 %v1752_v27  ;;  %v1554_v44 = vunpack.c.l.bf16 %v1752_v27  ;;  %v1602_v3 = vunpack.c.l.bf16 %v1763_v60  ;;  %v1770_v27 = vld [vmem:[%s2327_s11 + $0x18] sm:$0xff]  }
 0x23c   :  { %606 = vmatpush.msrb.mxu1 %v1462_v45  ;;  %686 = vmatpush.msra.mxu0 %v1507_v46  ;;  %v856_v45 = vrot.slane %v2154_v41, 6  ;;  %v1767_v46 = vld [vmem:[%s2325_s9 + $0x38] sm:$0xff]  }
 0x23d   :  { %904 = vmatpush.msra.mxu3 %v883_v9  ;;  %v1619_v47 = vunpack.c.h.bf16 %v1767_v46 }
 0x23e   :  { %607 = vmatpush.msrb.mxu1 %v1459_v48  ;;  %687 = vmatpush.msra.mxu0 %v1506_v49  ;;  %v300_v48 = vpop.f32.mrf.mxu3  ;;  %v1618_v49 = vunpack.c.l.bf16 %v1767_v46 }
 0x23f   :  { %1203 = vmatmul.msk.f32.vlgmr.msrb.gmra.mxu0 %vm61_vm0, %v1916_v6  ;;  %1243 = vmatmul.msk.f32.vlgmr.msrb.gmra.mxu3 %vm61_vm0, %v799_v51  ;;  %v1582_v6 = vunpack.c.l.bf16 %v1759_v10  ;;  %v1785_v51 = vld [vmem:[%s2324_s8] ss:$0 sm:$0xff] }
 0x240   :  { %608 = vmatpush.msrb.mxu1 %v1458_v52  ;;  %688 = vmatpush.msra.mxu0 %v1503_v53  ;;  %v1614_v53 = vunpack.c.l.bf16 %v1766_v50 }
 0x241   :  { %949 = vmatpush.msrb.mxu3 %v1619_v47  ;;  %v1769_v47 = vld [vmem:[%s2327_s11 + $0x10] sm:$0xff]  }
 0x242   :  { %609 = vmatpush.msrb.mxu1 %v1455_v55  ;;  %689 = vmatpush.msra.mxu0 %v1502_v56  ;;  %v1611_v56 = vunpack.c.h.bf16 %v1765_v54 }
 0x243   :  { %950 = vmatpush.msrb.mxu3 %v1618_v49 }
 0x244   :  { %610 = vmatpush.msrb.mxu1 %v1454_v58  ;;  %690 = vmatpush.msra.mxu0 %v1499_v30  ;;  %v1764_v58 = vld [vmem:[%s2325_s9 + $0x20] sm:$0xff]  }
 0x245   :  { %v1607_v59 = vunpack.c.h.bf16 %v1764_v58 }
 0x246   :  { %611 = vmatpush.msrb.mxu1 %v1451_v62  ;;  %691 = vmatpush.msra.mxu0 %v1498_v63  ;;  %v388_v30 = vpop.f32.mrf.mxu3  ;;  %v1606_v62 = vunpack.c.l.bf16 %v1764_v58  ;;  %v1603_v63 = vunpack.c.h.bf16 %v1763_v60  ;;  %v1621_v60 = vld [vmem:[%s2327_s11] sm:$0xff]  }
 0x247   :  { %1263 = vmatmul.msk.f32.vlgmr.msra.gmra.mxu3 %vm61_vm0, %v886_v11  ;;  %v1761_v11 = vld [vmem:[%s2325_s9 + $0x8] sm:$0xff]  }
 0x248   :  { %612 = vmatpush.msrb.mxu1 %v1450_v1  ;;  %692 = vmatpush.msra.mxu0 %v1495_v2  ;;  %v1762_v1 = vld [vmem:[%s2325_s9 + $0x10] sm:$0xff]  }
 0x249   :  { %v1599_v4 = vunpack.c.h.bf16 %v1762_v1 }
 0x24a   :  { %613 = vmatpush.msrb.mxu1 %v1447_v7  ;;  %693 = vmatpush.msra.mxu0 %v1494_v8  ;;  %v1598_v8 = vunpack.c.l.bf16 %v1762_v1 }
 0x24c   :  { %614 = vmatpush.msrb.mxu1 %v1446_v12  ;;  %694 = vmatpush.msra.mxu0 %v1491_v13  ;;  %v1595_v13 = vunpack.c.h.bf16 %v1761_v11 }
 0x24d   :  { %615 = vmatmul.f32.vlgmr.msrb.gmra.mxu1 %v2154_v41  ;;  %v1615_v41 = vunpack.c.h.bf16 %v1766_v50  ;;  %v1631_v50 = vunpack.c.h.bf16 %v1769_v47 }
 0x24e   :  { %858 = vmatpush.msra.mxu1 %v1583_v15  ;;  %695 = vmatpush.msra.mxu0 %v1490_v16  ;;  %v1594_v15 = vunpack.c.l.bf16 %v1761_v11  ;;  %v1589_v16 = vld [vmem:[%s2325_s9] sm:$0xff]  }
 0x24f   :  { %951 = vmatpush.msrb.mxu3 %v1615_v41  ;;  %v1630_v41 = vunpack.c.l.bf16 %v1769_v47 }
 0x250   :  { %859 = vmatpush.msra.mxu1 %v1582_v6  ;;  %696 = vmatpush.msra.mxu0 %v1487_v18  ;;  %v1591_v6 = vunpack.c.h.bf16 %v1589_v16  ;;  %v1590_v18 = vunpack.c.l.bf16 %v1589_v16 }
 0x251   :  { %952 = vmatpush.msrb.mxu3 %v1614_v53 }
 0x252   :  { %860 = vmatpush.msra.mxu1 %v1579_v20  ;;  %697 = vmatpush.msra.mxu0 %v1486_v21 }
 0x253   :  { %953 = vmatpush.msrb.mxu3 %v1611_v56 }
 0x254   :  { %861 = vmatpush.msra.mxu1 %v1578_v23  ;;  %698 = vmatpush.msra.mxu0 %v1483_v24  ;;  %v1773_v23 = vld [vmem:[%s2327_s11 + $0x30] sm:$0xff]   ;;  %v1651_v24 = vunpack.c.h.bf16 %v1774_v22 }
 0x255   :  { %954 = vmatpush.msrb.mxu3 %v1610_v57  ;;  %v1647_v29 = vunpack.c.h.bf16 %v1773_v23  ;;  %v1646_v33 = vunpack.c.l.bf16 %v1773_v23 }
 0x256   :  { %862 = vmatpush.msra.mxu1 %v1575_v25  ;;  %699 = vmatpush.msra.mxu0 %v1482_v26  ;;  %v1650_v25 = vunpack.c.l.bf16 %v1774_v22 }
 0x257   :  { %700 = vmatmul.f32.vlgmr.msra.gmra.mxu0 %v682_v28  ;;  %955 = vmatpush.msrb.mxu3 %v1607_v59 }
 0x258   :  { %863 = vmatpush.msra.mxu1 %v1574_v31  ;;  %1008 = vmatpush.msrb.mxu0 %v1651_v24  ;;  %v1772_v31 = vld [vmem:[%s2327_s11 + $0x28] sm:$0xff]  }
 0x259   :  { %956 = vmatpush.msrb.mxu3 %v1606_v62  ;;  %v1642_v5 = vunpack.c.l.bf16 %v1772_v31  ;;  %v1622_v62 = vunpack.c.l.bf16 %v1621_v60 }
 0x25a   :  { %864 = vmatpush.msra.mxu1 %v1571_v32  ;;  %1009 = vmatpush.msrb.mxu0 %v1650_v25 }
 0x25b   :  { %957 = vmatpush.msrb.mxu3 %v1603_v63  ;;  %v1781_v63 = vld [vmem:[%s2329_s13 + $0x38] sm:$0xff]  }
 0x25c   :  { %865 = vmatpush.msra.mxu1 %v1570_v34  ;;  %1010 = vmatpush.msrb.mxu0 %v1647_v29  ;;  %v1683_v1 = vunpack.c.h.bf16 %v1781_v63 }
 0x25d   :  { %958 = vmatpush.msrb.mxu3 %v1602_v3 }
 0x25e   :  { %866 = vmatpush.msra.mxu1 %v1567_v35  ;;  %v1643_v35 = vunpack.c.h.bf16 %v1772_v31  ;;  %1011 = vmatpush.msrb.mxu0 %v1646_v33  ;;  %v1787_v31 = vld [vmem:[%s2328_s12] ss:$0 sm:$0xff]  ;;  %s1819_s12 = smov [#allocation2]  }
 0x25f   :  { %959 = vmatpush.msrb.mxu3 %v1599_v4  ;;  %1067 = vmatpush.msrb.mxu2 %v1683_v1  ;;  %v1779_v4 = vld [vmem:[%s2329_s13 + $0x28] sm:$0xff]  }
 0x260   :  { %867 = vmatpush.msra.mxu1 %v1566_v37  ;;  %v1771_v37 = vld [vmem:[%s2327_s11 + $0x20] sm:$0xff]   ;;  %1012 = vmatpush.msrb.mxu0 %v1643_v35 }
 0x261   :  { %960 = vmatpush.msrb.mxu3 %v1598_v8  ;;  %v1675_v8 = vunpack.c.h.bf16 %v1779_v4 }
 0x262   :  { %868 = vmatpush.msra.mxu1 %v1563_v38  ;;  %1013 = vmatpush.msrb.mxu0 %v1642_v5 }
 0x263   :  { %961 = vmatpush.msrb.mxu3 %v1595_v13 }
 0x264   :  { %869 = vmatpush.msra.mxu1 %v1562_v39 }
 0x265   :  { %962 = vmatpush.msrb.mxu3 %v1594_v15  ;;  %v1776_v15 = vld [vmem:[%s2329_s13 + $0x10] sm:$0xff]  }
 0x266   :  { %870 = vmatpush.msra.mxu1 %v1559_v40  ;;  %v1639_v40 = vunpack.c.h.bf16 %v1771_v37 }
 0x267   :  { %963 = vmatpush.msrb.mxu3 %v1591_v6  ;;  %v1775_v6 = vld [vmem:[%s2329_s13 + $0x8] sm:$0xff]  }
 0x268   :  { %871 = vmatpush.msra.mxu1 %v1558_v42  ;;  %v1638_v42 = vunpack.c.l.bf16 %v1771_v37  ;;  %1014 = vmatpush.msrb.mxu0 %v1639_v40  ;;  %v1658_v25 = vunpack.c.l.bf16 %v1775_v6 }
 0x269   :  { %964 = vmatpush.msrb.mxu3 %v1590_v18  ;;  %v1662_v18 = vunpack.c.l.bf16 %v1776_v15 }
 0x26a   :  { %872 = vmatpush.msra.mxu1 %v1555_v43  ;;  %1015 = vmatpush.msrb.mxu0 %v1638_v42 }
 0x26c   :  { %873 = vmatpush.msra.mxu1 %v1554_v44  ;;  %v1635_v44 = vunpack.c.h.bf16 %v1770_v27 }
 0x26d   :  { %874 = vmatmul.f32.vlgmr.msra.gmra.mxu1 %v856_v45 }
 0x26e   :  { %1016 = vmatpush.msrb.mxu0 %v1635_v44 }
 0x2aa   :  { %v273_v52 = vpop.f32.mrf.mxu1 }
 0x2ab   :  { %v276_v55 = vadd.f32 %v1785_v51, %v273_v52  ;;  %v1768_v51 = vld [vmem:[%s2327_s11 + $0x8] sm:$0xff]  }
 0x2ac   :  { %v357_v0 = vpop.f32.mrf.mxu0  ;;  %v1627_v53 = vunpack.c.h.bf16 %v1768_v51  ;;  %v1626_v59 = vunpack.c.l.bf16 %v1768_v51 }
 0x2ad   :  { %v303_v61 = vadd.f32 %v300_v48, %v276_v55  ;;  %v1634_v48 = vunpack.c.l.bf16 %v1770_v27 }
 0x2af   :  { %v360_v2 = vadd.f32 %v357_v0, %v303_v61  ;;  %1017 = vmatpush.msrb.mxu0 %v1634_v48  ;;  %v1623_v61 = vunpack.c.h.bf16 %v1621_v60  ;;  %v1780_v0 = vld [vmem:[%s2329_s13 + $0x30] sm:$0xff]  }
 0x2b0   :  { %v1679_v3 = vunpack.c.h.bf16 %v1780_v0 }
 0x2b1   :  { %v391_v7 = vadd.f32 %v388_v30, %v360_v2  ;;  %1018 = vmatpush.msrb.mxu0 %v1631_v50  ;;  %v1682_v2 = vunpack.c.l.bf16 %v1781_v63 }
 0x2b2   :  { %v444_v9 = vpop.f32.mrf.mxu3  ;;  %v475_v14 = vpop.f32.mrf.mxu1 }
 0x2b3   :  { %v447_v12 = vadd.f32 %v444_v9, %v391_v7  ;;  %v531_v19 = vpop.f32.mrf.mxu2  ;;  %1019 = vmatpush.msrb.mxu0 %v1630_v41  ;;  %1068 = vmatpush.msrb.mxu2 %v1682_v2  ;;  %v1678_v7 = vunpack.c.l.bf16 %v1780_v0  ;;  %v1778_v9 = vld [vmem:[%s2329_s13 + $0x20] sm:$0xff]  }
 0x2b4   :  { %v562_v10 = vpop.f32.mrf.mxu0  ;;  %v1671_v11 = vunpack.c.h.bf16 %v1778_v9  ;;  %v1670_v13 = vunpack.c.l.bf16 %v1778_v9 }
 0x2b5   :  { %v478_v17 = vadd.f32 %v475_v14, %v447_v12  ;;  %1020 = vmatpush.msrb.mxu0 %v1627_v53  ;;  %1069 = vmatpush.msrb.mxu2 %v1679_v3  ;;  %v1777_v12 = vld [vmem:[%s2329_s13 + $0x18] sm:$0xff]  }
 0x2b6   :  { %v1667_v14 = vunpack.c.h.bf16 %v1777_v12  ;;  %v1666_v16 = vunpack.c.l.bf16 %v1777_v12 }
 0x2b7   :  { %v534_v21 = vadd.f32 %v531_v19, %v478_v17  ;;  %1021 = vmatpush.msrb.mxu0 %v1626_v59  ;;  %1070 = vmatpush.msrb.mxu2 %v1678_v7  ;;  %v1663_v17 = vunpack.c.h.bf16 %v1776_v15  ;;  %v1786_v19 = vld [vmem:[%s2326_s10] ss:$0 sm:$0xff] }
 0x2b9   :  { %v565_v28 = vadd.f32 %v562_v10, %v534_v21  ;;  %1022 = vmatpush.msrb.mxu0 %v1623_v61  ;;  %v1674_v10 = vunpack.c.l.bf16 %v1779_v4  ;;  %1071 = vmatpush.msrb.mxu2 %v1675_v8 }
 0x2ba   :  { %v732_v34 = vpop.f32.mrf.mxu3 }
 0x2bb   :  { %1023 = vmatpush.msrb.mxu0 %v1622_v62  ;;  %1072 = vmatpush.msrb.mxu2 %v1674_v10 }
 0x2bc   :  { %v644_v20 = vpop.f32.mrf.mxu0  ;;  %v788_v45 = vpop.f32.mrf.mxu2 }
 0x2bd   :  { %1073 = vmatpush.msrb.mxu2 %v1671_v11 }
 0x2bf   :  { %1074 = vmatpush.msrb.mxu2 %v1670_v13 }
 0x2c1   :  { %1075 = vmatpush.msrb.mxu2 %v1667_v14 }
 0x2c2   :  { %v819_v46 = vpop.f32.mrf.mxu3 }
 0x2c3   :  { %1076 = vmatpush.msrb.mxu2 %v1666_v16 }
 0x2c5   :  { %1077 = vmatpush.msrb.mxu2 %v1663_v17 }
 0x2c7   :  { %1078 = vmatpush.msrb.mxu2 %v1662_v18 }
 0x2ca   :  { %v616_v26 = vpop.f32.mrf.mxu1  ;;  %v906_v55 = vpop.f32.mrf.mxu3 }
 0x2cb   :  { %v619_v32 = vadd.f32 %v616_v26, %v565_v28  ;;  %v1653_v26 = vld [vmem:[%s2329_s13] sm:$0xff]   ;;  %s1106_s13 = sshll.u32 %s1819_s12, 4  ;;  %s1107_s13 = int_to_ptr.vmem [resolvable:$true] %s1106_s13 }
 0x2cc   :  { %v1655_v28 = vunpack.c.h.bf16 %v1653_v26  ;;  %v1654_v29 = vunpack.c.l.bf16 %v1653_v26 }
 0x2cd   :  { %v647_v38 = vadd.f32 %v644_v20, %v619_v32  ;;  %v1659_v20 = vunpack.c.h.bf16 %v1775_v6 }
 0x2cf   :  { %1079 = vmatpush.msrb.mxu2 %v1659_v20 }
 0x2d1   :  { %1080 = vmatpush.msrb.mxu2 %v1658_v25 }
 0x2d3   :  { %1081 = vmatpush.msrb.mxu2 %v1655_v28 }
 0x2d4   :  { %v701_v36 = vpop.f32.mrf.mxu0 }
 0x2d5   :  { %v704_v39 = vadd.f32 %v701_v36, %v647_v38  ;;  %1082 = vmatpush.msrb.mxu2 %v1654_v29  ;;  %v1788_v36 = vld [vmem:[%s2330_s14] ss:$0 sm:$0xff] }
 0x2d7   :  { %v735_v43 = vadd.f32 %v732_v34, %v704_v39 }
 0x2d9   :  { %v791_v49 = vadd.f32 %v788_v45, %v735_v43 }
 0x2db   :  { %v822_v52 = vadd.f32 %v819_v46, %v791_v49 }
 0x2ea   :  { %v875_v54 = vpop.f32.mrf.mxu1 }
 0x2eb   :  { %v878_v56 = vadd.f32 %v875_v54, %v822_v52 }
 0x2ed   :  { %v909_v57 = vadd.f32 %v906_v55, %v878_v56 }
 0x2ef   :  { %vm910_vm6 = vcmp.gt.f32.partialorder %v909_v57, 0.0  ;;  %v911_v58 = vmul.f32 0.01, %v909_v57 }
 0x2f1   :  { %v912_v30 = vsel %vm910_vm6, %v909_v57, %v911_v58 }
 0x2f2   :  { %965 = vmatmul.f32.vlgmr.msrb.gmra.mxu3 %v912_v30 }
 0x375   :  { %v966_v21 = vpop.f32.mrf.mxu3 }
 0x376   :  { %v967_v22 = vadd.f32 %v1786_v19, %v966_v21 }
 0x378   :  { %vm969_vm7 = vcmp.gt.f32.partialorder %v967_v22, 0.0  ;;  %v970_v23 = vmul.f32 0.01, %v967_v22 }
 0x37a   :  { %v971_v24 = vsel %vm969_vm7, %v967_v22, %v970_v23 }
 0x37b   :  { %1024 = vmatmul.f32.vlgmr.msrb.gmra.mxu0 %v971_v24 }
 0x3f8   :  { %v1025_v32 = vpop.f32.mrf.mxu0 }
 0x3f9   :  { %v1026_v33 = vadd.f32 %v1787_v31, %v1025_v32 }
 0x3fb   :  { %vm1028_vm8 = vcmp.gt.f32.partialorder %v1026_v33, 0.0  ;;  %v1029_v34 = vmul.f32 0.01, %v1026_v33 }
 0x3fd   :  { %v1030_v35 = vsel %vm1028_vm8, %v1026_v33, %v1029_v34 }
 0x3fe   :  { %1083 = vmatmul.f32.vlgmr.msrb.gmra.mxu2 %v1030_v35 }
 0x481   :  { %v1084_v37 = vpop.f32.mrf.mxu2 }
 0x482   :  { %v1085_v38 = vadd.f32 %v1788_v36, %v1084_v37 }
 0x484   :  { %v1088_v5 = vsel %vm1087_vm9, %v1085_v38, -inf }
 0x485   :  { %1089 = vmax.xlane.f32.xlu0 %v1088_v5 }
 0x4f8   :  { %v1090_v39 = vpop.xlane.xlu0 %1089 }
 0x4f9   :  { %v1091_v40 = vsub.f32 %v1085_v38, %v1090_v39 }
 0x4fb   :  { %v1092_v27 = vmul.f32 1.442695, %v1091_v40 }
 0x4fd   :  { %1789 = vpow2.f32 %v1092_v27 }
 0x503   :  { %v1790_v42 = vpop.eup %1789 }
 0x504   :  { %v1094_v43 = vsel %vm1087_vm9, %v1790_v42, 0.0 }
 0x505   :  { %1095 = vadd.xlane.f32.xlu0 %v1094_v43 }
 0x578   :  { %v1096_v44 = vpop.xlane.xlu0 %1095 }
 0x579   :  { %1791 = vlog2.f32 %v1096_v44 }
 0x57f   :  { %v1792_v45 = vpop.eup %1791 }
 0x580   :  { %v1098_v46 = vmul.f32 0.6931472, %v1792_v45 }
 0x582   :  { %v1099_v47 = vsub.f32 %v1091_v40, %v1098_v46 }
 0x584   :  { %1100 = vst.msk [vmem:[#allocation2] sm:$0x3] %vm1087_vm9, %v1099_v47 }
 0x585   :  { %1111 = dma.vmem_to_hbm [thread:$0]  %s1107_s13, 32, %s1109_s24, [#allocation3]  }
 0x586   :  { %1817 = dma.done.wait [#allocation3], 32  }
 0x587   :  { %1818 = vsyncadd [#allocation3], 4294967264 }
 0x588   :  { %1116 = vsyncpa [#allocation3], 1 }

</bundles_post_ra>
